<compile_context>
chip_gen: v5e
topology: v5e:2x2
jax: 0.10.0
libtpu: 0.0.40
codegen_flags: <defaults>
</compile_context>

<pallas_src>
import functools

import jax
import jax.numpy as jnp
from jax import lax
from jax.experimental import pallas as pl
from jax.experimental.pallas import tpu as pltpu

NUM_CLASSES = 19
_LANE = 128
_CHUNK_CAP = 2048                       # lanes per in-kernel compute chunk (bounds temp VMEM)
_PIPE_BYTES_PER_PIXEL = 448             # 2 bufs x (s 24x4 + t 24x4 + g padded row) per HW elem
_TEMP_RESERVE_BYTES = 10 * 1024 * 1024  # chunk temporaries + scratch + compiler slack
_HIGHEST = lax.Precision.HIGHEST


def _round_up(x, m):
    return -(-x // m) * m


def _vmem_limit_bytes():
    """Generation-aware scoped-VMEM limit (96 MiB on 128-MiB chips, 48 MiB on v7x)."""
    cap = None
    try:
        cap = getattr(pltpu.get_tpu_info(), "vmem_capacity_bytes", None)
    except Exception:
        cap = None
    if not cap:
        cap = 64 * 1024 * 1024          # conservative fallback (v7x has the smallest VMEM)
    limit = min((int(cap) * 3) // 4, 96 * 1024 * 1024)
    return max(limit, 32 * 1024 * 1024)


def _plan_tiles(hw, vmem_limit, tile_hw=None):
    """Pick (tile T, num tiles HT, padded HW, in-kernel chunk)."""
    if tile_hw is not None:             # debug override
        t = _round_up(tile_hw, _LANE)
        chunk = min(_CHUNK_CAP, t)
        t = _round_up(t, chunk)
        ht = -(-hw // t)
        return t, ht, t * ht, chunk
    t_cap = max(_LANE, (vmem_limit - _TEMP_RESERVE_BYTES) // _PIPE_BYTES_PER_PIXEL)
    t_cap = (t_cap // _LANE) * _LANE
    ht = max(1, -(-hw // t_cap))        # HT == 1 whenever full HW fits the budget
    t = _round_up(-(-hw // ht), _LANE)
    chunk = min(_CHUNK_CAP, t)
    t = _round_up(t, chunk)
    return t, ht, t * ht, chunk


def ifvd_kernel(s_ref, t_ref, g_ref, out_ref, ssum_ref, tsum_ref, cnt_ref, *, chunk):
    """IFVD hot path on a resident (C, T) feature tile, processed in `chunk`-lane pieces."""
    ph = pl.program_id(1)               # 0: class-sum accumulation, 1: cosine-sim / SSE
    h = pl.program_id(2)                # HW-tile index
    T = s_ref.shape[1]
    n_chunks = T // chunk

    # One-hot class axis on sublanes, pixels on lanes.
    cls = lax.broadcasted_iota(jnp.int32, (NUM_CLASSES, chunk), 0)

    @pl.when((ph == 0) & (h == 0))
    def _():
        out_ref[...] = jnp.zeros_like(out_ref)
        ssum_ref[...] = jnp.zeros_like(ssum_ref)
        tsum_ref[...] = jnp.zeros_like(tsum_ref)
        cnt_ref[...] = jnp.zeros_like(cnt_ref)

    @pl.when(ph == 0)
    def _():
        def body(c, carry):
            off = pl.multiple_of(c * chunk, chunk)
            s = s_ref[:, pl.ds(off, chunk)]                      # (C, chunk)
            t = t_ref[:, pl.ds(off, chunk)]
            g = g_ref[:, pl.ds(off, chunk)]                      # (1, chunk) int32
            onehot = (g == cls).astype(jnp.float32)              # (19, chunk)
            # Per-class channel sums: onehot @ x^T -> (19, C); K = chunk (the big dim).
            dims_bt = (((1,), (1,)), ((), ()))
            ssum_ref[...] += lax.dot_general(onehot, s, dims_bt, precision=_HIGHEST,
                                             preferred_element_type=jnp.float32)
            tsum_ref[...] += lax.dot_general(onehot, t, dims_bt, precision=_HIGHEST,
                                             preferred_element_type=jnp.float32)
            # Per-class pixel counts (lane reduce; XLU idle in this phase).
            cnt_ref[...] += jnp.sum(onehot, axis=1, keepdims=True)
            return carry
        lax.fori_loop(0, n_chunks, body, 0)

    @pl.when(ph == 1)
    def _():
        denom = cnt_ref[...] + 1e-6                              # (19, 1)
        means_s = ssum_ref[...] / denom                          # (19, C) class means
        means_t = tsum_ref[...] / denom
        mnorm_s = jnp.sum(means_s * means_s, axis=1, keepdims=True)   # (19, 1)
        mnorm_t = jnp.sum(means_t * means_t, axis=1, keepdims=True)

        def body(c, carry):
            off = pl.multiple_of(c * chunk, chunk)
            s = s_ref[:, pl.ds(off, chunk)]
            t = t_ref[:, pl.ds(off, chunk)]
            g = g_ref[:, pl.ds(off, chunk)]
            onehot = (g == cls).astype(jnp.float32)              # (19, chunk)
            # Per-pixel dot(x, mean[class(x)]): class projections on the MXU + one-hot select.
            dims_mm = (((1,), (0,)), ((), ()))
            proj_s = lax.dot_general(means_s, s, dims_mm, precision=_HIGHEST,
                                     preferred_element_type=jnp.float32)   # (19, chunk)
            proj_t = lax.dot_general(means_t, t, dims_mm, precision=_HIGHEST,
                                     preferred_element_type=jnp.float32)
            dot_s = jnp.sum(onehot * proj_s, axis=0, keepdims=True)        # (1, chunk)
            dot_t = jnp.sum(onehot * proj_t, axis=0, keepdims=True)
            # Selected class-mean squared norm and per-pixel feature squared norm.
            csq_s = jnp.sum(onehot * mnorm_s, axis=0, keepdims=True)
            csq_t = jnp.sum(onehot * mnorm_t, axis=0, keepdims=True)
            xsq_s = jnp.sum(s * s, axis=0, keepdims=True)
            xsq_t = jnp.sum(t * t, axis=0, keepdims=True)
            # torch CosineSimilarity(dim=1, eps=1e-8); exact eps-clamped divide kept for parity.
            cos_s = dot_s / jnp.maximum(jnp.sqrt(xsq_s * csq_s), 1e-8)
            cos_t = dot_t / jnp.maximum(jnp.sqrt(xsq_t * csq_t), 1e-8)
            diff = cos_s - cos_t
            sse = jnp.sum(diff * diff)
            out_ref[...] += jnp.full(out_ref.shape, sse, jnp.float32)
            return carry
        lax.fori_loop(0, n_chunks, body, 0)


def ifvd_loss(preds_S, preds_T, gt, loss_weight=10.0, tile_hw=None):
    """preds_S, preds_T: (N, C, H, W) float32; gt: (N, 1, Hg, Wg) integer labels."""
    N, C, H, W = preds_S.shape
    assert preds_T.shape[-2:] == (H, W)
    HW = H * W

    # gt = F.interpolate(gt.float(), size=[H, W], mode='bilinear', align_corners=False).int()
    gt_r = jax.image.resize(gt.astype(jnp.float32),
                            (gt.shape[0], gt.shape[1], H, W),
                            method="bilinear").astype(jnp.int32)

    vmem_limit = _vmem_limit_bytes()
    T, HT, HW_pad, chunk = _plan_tiles(HW, vmem_limit, tile_hw)

    # Channel-minor, spatially flattened views: free reshapes, no HBM transpose.
    s = preds_S.reshape(N, C, HW)
    t = preds_T.reshape(N, C, HW)
    g = gt_r.reshape(N, 1, HW)

    # Lane-pad HW to a multiple of the tile.  Padding pixels get label NUM_CLASSES and zero
    # features; their one-hot row is all zero so they contribute exactly 0 everywhere.
    pad = HW_pad - HW
    if pad:
        s = jnp.pad(s, ((0, 0), (0, 0), (0, pad)))
        t = jnp.pad(t, ((0, 0), (0, 0), (0, pad)))
        g = jnp.pad(g, ((0, 0), (0, 0), (0, pad)), constant_values=NUM_CLASSES)

    kernel = functools.partial(ifvd_kernel, chunk=chunk)

    out = pl.pallas_call(
        kernel,
        out_shape=jax.ShapeDtypeStruct((N, 1, _LANE), jnp.float32),
        grid_spec=pltpu.PrefetchScalarGridSpec(
            num_scalar_prefetch=0,
            grid=(N, 2, HT),                               # (batch, phase, HW tile)
            in_specs=[
                # Block index is (n, 0, h); with HT == 1 it is constant across the phase
                # axis, so phase 1 reuses the resident VMEM block (no HBM re-read).
                pl.BlockSpec((None, C, T), lambda n, ph, h: (n, 0, h)),
                pl.BlockSpec((None, C, T), lambda n, ph, h: (n, 0, h)),
                pl.BlockSpec((None, 1, T), lambda n, ph, h: (n, 0, h)),
            ],
            out_specs=pl.BlockSpec((None, 1, _LANE), lambda n, ph, h: (n, 0, 0)),
            scratch_shapes=[
                pltpu.VMEM((NUM_CLASSES, C), jnp.float32),   # student class sums
                pltpu.VMEM((NUM_CLASSES, C), jnp.float32),   # teacher class sums
                pltpu.VMEM((NUM_CLASSES, 1), jnp.float32),   # class pixel counts
            ],
        ),
        compiler_params=pltpu.CompilerParams(
            dimension_semantics=("parallel", "arbitrary", "arbitrary"),
            vmem_limit_bytes=vmem_limit,
        ),
    )(s, t, g)

    # MSELoss is a mean over all N*H*W cosine-similarity elements (padding contributes 0).
    return loss_weight * jnp.sum(out[:, 0, 0]) / (N * HW)


def ref_ifvd_loss(preds_S, preds_T, gt, loss_weight=10.0, num_classes=NUM_CLASSES):
    """Pure-JAX reference mirroring the PyTorch per-class loop exactly."""
    N, C, H, W = preds_S.shape
    gt_r = jax.image.resize(gt.astype(jnp.float32),
                            (gt.shape[0], gt.shape[1], H, W),
                            method="bilinear").astype(jnp.int32)
    cS, cT = preds_S, preds_T
    for i in range(num_classes):
        m = (gt_r == i).astype(jnp.float32)                      # (N, 1, H, W)
        mS = (m * preds_S).sum(axis=(-1, -2)) / (m.sum(axis=(-1, -2)) + 1e-6)
        mT = (m * preds_T).sum(axis=(-1, -2)) / (m.sum(axis=(-1, -2)) + 1e-6)
        cS = (1 - m) * cS + m * mS[..., None, None]
        cT = (1 - m) * cT + m * mT[..., None, None]

    def cos(a, b):
        d = (a * b).sum(1)
        na = jnp.sqrt((a * a).sum(1))
        nb = jnp.sqrt((b * b).sum(1))
        return d / jnp.maximum(na * nb, 1e-8)

    pS = cos(preds_S, cS)
    pT = cos(preds_T, cT)
    return loss_weight * jnp.mean((pS - pT) ** 2)


if __name__ == "__main__":
    key = jax.random.PRNGKey(0)
    k1, k2, k3, k4, k5, k6 = jax.random.split(key, 6)

    # Case 1/2: 16x16 features, labels at 32x32 (includes out-of-range ignore values).
    N, C, H, W = 2, 19, 16, 16
    preds_S = jax.random.normal(k1, (N, C, H, W), dtype=jnp.float32)
    preds_T = jax.random.normal(k2, (N, C, H, W), dtype=jnp.float32)
    gt = jax.random.randint(k3, (N, 1, 32, 32), 0, NUM_CLASSES + 2, dtype=jnp.int32)

    ref = ref_ifvd_loss(preds_S, preds_T, gt)
    loss_a = jax.block_until_ready(ifvd_loss(preds_S, preds_T, gt))                 # HT=1 resident path
    loss_b = jax.block_until_ready(ifvd_loss(preds_S, preds_T, gt, tile_hw=128))    # multi-tile path
    assert jnp.allclose(loss_a, ref, rtol=1e-3, atol=1e-5), (float(loss_a), float(ref))
    assert jnp.allclose(loss_b, ref, rtol=1e-3, atol=1e-5), (float(loss_b), float(ref))

    # Case 3: non-128-divisible HW (48x48) -> exercises lane padding + multi-chunk inner loop.
    H2 = W2 = 48
    preds_S2 = jax.random.normal(k4, (N, C, H2, W2), dtype=jnp.float32)
    preds_T2 = jax.random.normal(k5, (N, C, H2, W2), dtype=jnp.float32)
    gt2 = jax.random.randint(k6, (N, 1, 64, 64), 0, NUM_CLASSES + 2, dtype=jnp.int32)
    ref2 = ref_ifvd_loss(preds_S2, preds_T2, gt2)
    loss_c = jax.block_until_ready(ifvd_loss(preds_S2, preds_T2, gt2))
    assert jnp.allclose(loss_c, ref2, rtol=1e-3, atol=1e-5), (float(loss_c), float(ref2))

    print("KERNEL_OK")
</pallas_src>

<mosaic_0001>
module attributes {stable_mosaic.version = 11 : i64} {
  func.func @ifvd_kernel(%arg0: i32, %arg1: i32, %arg2: i32, %arg3: memref<1x19x256xf32, #tpu.memory_space<vmem>>, %arg4: memref<1x19x256xf32, #tpu.memory_space<vmem>>, %arg5: memref<1x1x256xi32, #tpu.memory_space<vmem>>, %arg6: memref<1x1x128xf32, #tpu.memory_space<vmem>>, %arg7: memref<19x19xf32, #tpu.memory_space<vmem>>, %arg8: memref<19x19xf32, #tpu.memory_space<vmem>>, %arg9: memref<19x1xf32, #tpu.memory_space<vmem>>) attributes {dimension_semantics = [#tpu.dimension_semantics<parallel>, #tpu.dimension_semantics<arbitrary>, #tpu.dimension_semantics<arbitrary>], iteration_bounds = array<i64: 2, 2, 1>, scalar_prefetch = 0 : i64, scratch_operands = 3 : i64, tpu.core_type = #tpu.core_type<tc>, window_params = [{transform_indices = @transform_0, window_bounds = array<i64: 1, 19, 256>}, {transform_indices = @transform_1, window_bounds = array<i64: 1, 19, 256>}, {transform_indices = @transform_2, window_bounds = array<i64: 1, 1, 256>}, {transform_indices = @transform_3, window_bounds = array<i64: 1, 1, 128>}]} {
    %0 = tpu.iota {dimensions = array<i32: 0>} : vector<19x256xi32>
    %c0_i32 = arith.constant 0 : i32
    %1 = arith.cmpi eq, %arg1, %c0_i32 : i32
    %c0_i32_0 = arith.constant 0 : i32
    %2 = arith.cmpi eq, %arg2, %c0_i32_0 : i32
    %3 = arith.andi %1, %2 : i1
    %4 = arith.extui %3 : i1 to i32
    %c0_i32_1 = arith.constant 0 : i32
    %5 = arith.cmpi ne, %4, %c0_i32_1 : i32
    scf.if %5 {
      %cst = arith.constant 0.000000e+00 : f32
      %12 = vector.broadcast %cst : f32 to vector<1x128xf32>
      %c0 = arith.constant 0 : index
      %c0_5 = arith.constant 0 : index
      %c0_6 = arith.constant 0 : index
      %13 = vector.load %arg6[%c0, %c0_5, %c0_6] : memref<1x1x128xf32, #tpu.memory_space<vmem>>, vector<1x1x128xf32>
      %14 = vector.shape_cast %13 : vector<1x1x128xf32> to vector<1x128xf32>
      %15 = vector.shape_cast %12 : vector<1x128xf32> to vector<1x1x128xf32>
      tpu.vector_store %arg6[%c0, %c0_5, %c0_6], %15 {strides = array<i32>} : memref<1x1x128xf32, #tpu.memory_space<vmem>>, vector<1x1x128xf32>,
      %cst_7 = arith.constant 0.000000e+00 : f32
      %16 = vector.broadcast %cst_7 : f32 to vector<19x19xf32>
      %c0_8 = arith.constant 0 : index
      %c0_9 = arith.constant 0 : index
      %17 = vector.load %arg7[%c0_8, %c0_9] : memref<19x19xf32, #tpu.memory_space<vmem>>, vector<19x19xf32>
      tpu.vector_store %arg7[%c0_8, %c0_9], %16 {strides = array<i32>} : memref<19x19xf32, #tpu.memory_space<vmem>>, vector<19x19xf32>,
      %cst_10 = arith.constant 0.000000e+00 : f32
      %18 = vector.broadcast %cst_10 : f32 to vector<19x19xf32>
      %c0_11 = arith.constant 0 : index
      %c0_12 = arith.constant 0 : index
      %19 = vector.load %arg8[%c0_11, %c0_12] : memref<19x19xf32, #tpu.memory_space<vmem>>, vector<19x19xf32>
      tpu.vector_store %arg8[%c0_11, %c0_12], %18 {strides = array<i32>} : memref<19x19xf32, #tpu.memory_space<vmem>>, vector<19x19xf32>,
      %cst_13 = arith.constant 0.000000e+00 : f32
      %20 = vector.broadcast %cst_13 : f32 to vector<19x1xf32>
      %c0_14 = arith.constant 0 : index
      %c0_15 = arith.constant 0 : index
      %21 = vector.load %arg9[%c0_14, %c0_15] : memref<19x1xf32, #tpu.memory_space<vmem>>, vector<19x1xf32>
      tpu.vector_store %arg9[%c0_14, %c0_15], %20 {strides = array<i32>} : memref<19x1xf32, #tpu.memory_space<vmem>>, vector<19x1xf32>,
    } else {
    }
    %c0_i32_2 = arith.constant 0 : i32
    %6 = arith.cmpi eq, %arg1, %c0_i32_2 : i32
    %7 = arith.extui %6 : i1 to i32
    %c0_i32_3 = arith.constant 0 : i32
    %8 = arith.cmpi ne, %7, %c0_i32_3 : i32
    scf.if %8 {
      %c0_i32_5 = arith.constant 0 : i32
      %c256_i32 = arith.constant 256 : i32
      %12 = arith.muli %c0_i32_5, %c256_i32 : i32
      %13 = tpu.assume_multiple %12, 256 : i32
      %c0 = arith.constant 0 : index
      %c0_6 = arith.constant 0 : index
      %14 = arith.index_cast %13 : i32 to index
      %15 = vector.load %arg3[%c0, %c0_6, %14] : memref<1x19x256xf32, #tpu.memory_space<vmem>>, vector<1x19x256xf32>
      %16 = vector.shape_cast %15 : vector<1x19x256xf32> to vector<19x256xf32>
      %c0_7 = arith.constant 0 : index
      %c0_8 = arith.constant 0 : index
      %17 = arith.index_cast %13 : i32 to index
      %18 = vector.load %arg4[%c0_7, %c0_8, %17] : memref<1x19x256xf32, #tpu.memory_space<vmem>>, vector<1x19x256xf32>
      %19 = vector.shape_cast %18 : vector<1x19x256xf32> to vector<19x256xf32>
      %c0_9 = arith.constant 0 : index
      %c0_10 = arith.constant 0 : index
      %20 = arith.index_cast %13 : i32 to index
      %21 = vector.load %arg5[%c0_9, %c0_10, %20] : memref<1x1x256xi32, #tpu.memory_space<vmem>>, vector<1x1x256xi32>
      %22 = vector.shape_cast %21 : vector<1x1x256xi32> to vector<1x256xi32>
      %23 = vector.broadcast %22 : vector<1x256xi32> to vector<19x256xi32>
      %24 = arith.cmpi eq, %23, %0 : vector<19x256xi32>
      %25 = arith.extui %24 : vector<19x256xi1> to vector<19x256xi32>
      %26 = arith.sitofp %25 : vector<19x256xi32> to vector<19x256xf32>
      %c0_11 = arith.constant 0 : index
      %c0_12 = arith.constant 0 : index
      %27 = vector.load %arg7[%c0_11, %c0_12] : memref<19x19xf32, #tpu.memory_space<vmem>>, vector<19x19xf32>
      %cst = arith.constant dense<0.000000e+00> : vector<19x19xf32>
      %28 = tpu.matmul %26, %16, %cst {dimension_numbers = #tpu.dot_dimension_numbers<[1], [1], [0], [0], [0, 0, 1, 0], [], []>, precision = #tpu.contract_precision<fp32>} : vector<19x256xf32>, vector<19x256xf32>, vector<19x19xf32> -> vector<19x19xf32>
      %29 = arith.addf %27, %28 : vector<19x19xf32>
      %c0_13 = arith.constant 0 : index
      %c0_14 = arith.constant 0 : index
      %30 = vector.load %arg7[%c0_13, %c0_14] : memref<19x19xf32, #tpu.memory_space<vmem>>, vector<19x19xf32>
      tpu.vector_store %arg7[%c0_13, %c0_14], %29 {strides = array<i32>} : memref<19x19xf32, #tpu.memory_space<vmem>>, vector<19x19xf32>,
      %c0_15 = arith.constant 0 : index
      %c0_16 = arith.constant 0 : index
      %31 = vector.load %arg8[%c0_15, %c0_16] : memref<19x19xf32, #tpu.memory_space<vmem>>, vector<19x19xf32>
      %cst_17 = arith.constant dense<0.000000e+00> : vector<19x19xf32>
      %32 = tpu.matmul %26, %19, %cst_17 {dimension_numbers = #tpu.dot_dimension_numbers<[1], [1], [0], [0], [0, 0, 1, 0], [], []>, precision = #tpu.contract_precision<fp32>} : vector<19x256xf32>, vector<19x256xf32>, vector<19x19xf32> -> vector<19x19xf32>
      %33 = arith.addf %31, %32 : vector<19x19xf32>
      %c0_18 = arith.constant 0 : index
      %c0_19 = arith.constant 0 : index
      %34 = vector.load %arg8[%c0_18, %c0_19] : memref<19x19xf32, #tpu.memory_space<vmem>>, vector<19x19xf32>
      tpu.vector_store %arg8[%c0_18, %c0_19], %33 {strides = array<i32>} : memref<19x19xf32, #tpu.memory_space<vmem>>, vector<19x19xf32>,
      %c0_20 = arith.constant 0 : index
      %c0_21 = arith.constant 0 : index
      %35 = vector.load %arg9[%c0_20, %c0_21] : memref<19x1xf32, #tpu.memory_space<vmem>>, vector<19x1xf32>
      %cst_22 = arith.constant dense<0.000000e+00> : vector<19xf32>
      %36 = vector.multi_reduction <add>, %26, %cst_22 [1] : vector<19x256xf32> to vector<19xf32>
      %37 = vector.shape_cast %36 : vector<19xf32> to vector<19x1xf32>
      %38 = arith.addf %35, %37 : vector<19x1xf32>
      %c0_23 = arith.constant 0 : index
      %c0_24 = arith.constant 0 : index
      %39 = vector.load %arg9[%c0_23, %c0_24] : memref<19x1xf32, #tpu.memory_space<vmem>>, vector<19x1xf32>
      tpu.vector_store %arg9[%c0_23, %c0_24], %38 {strides = array<i32>} : memref<19x1xf32, #tpu.memory_space<vmem>>, vector<19x1xf32>,
      %c1_i32_25 = arith.constant 1 : i32
    } else {
    }
    %c1_i32 = arith.constant 1 : i32
    %9 = arith.cmpi eq, %arg1, %c1_i32 : i32
    %10 = arith.extui %9 : i1 to i32
    %c0_i32_4 = arith.constant 0 : i32
    %11 = arith.cmpi ne, %10, %c0_i32_4 : i32
    scf.if %11 {
      %c0 = arith.constant 0 : index
      %c0_5 = arith.constant 0 : index
      %12 = vector.load %arg9[%c0, %c0_5] : memref<19x1xf32, #tpu.memory_space<vmem>>, vector<19x1xf32>
      %cst = arith.constant 9.99999997E-7 : f32
      %13 = vector.broadcast %cst : f32 to vector<19x1xf32>
      %14 = arith.addf %12, %13 : vector<19x1xf32>
      %c0_6 = arith.constant 0 : index
      %c0_7 = arith.constant 0 : index
      %15 = vector.load %arg7[%c0_6, %c0_7] : memref<19x19xf32, #tpu.memory_space<vmem>>, vector<19x19xf32>
      %16 = vector.broadcast %14 : vector<19x1xf32> to vector<19x19xf32>
      %17 = arith.divf %15, %16 : vector<19x19xf32>
      %c0_8 = arith.constant 0 : index
      %c0_9 = arith.constant 0 : index
      %18 = vector.load %arg8[%c0_8, %c0_9] : memref<19x19xf32, #tpu.memory_space<vmem>>, vector<19x19xf32>
      %19 = vector.broadcast %14 : vector<19x1xf32> to vector<19x19xf32>
      %20 = arith.divf %18, %19 : vector<19x19xf32>
      %21 = arith.mulf %17, %17 : vector<19x19xf32>
      %cst_10 = arith.constant dense<0.000000e+00> : vector<19xf32>
      %22 = vector.multi_reduction <add>, %21, %cst_10 [1] : vector<19x19xf32> to vector<19xf32>
      %23 = vector.shape_cast %22 : vector<19xf32> to vector<19x1xf32>
      %24 = arith.mulf %20, %20 : vector<19x19xf32>
      %cst_11 = arith.constant dense<0.000000e+00> : vector<19xf32>
      %25 = vector.multi_reduction <add>, %24, %cst_11 [1] : vector<19x19xf32> to vector<19xf32>
      %26 = vector.shape_cast %25 : vector<19xf32> to vector<19x1xf32>
      %c0_i32_12 = arith.constant 0 : i32
      %c256_i32 = arith.constant 256 : i32
      %27 = arith.muli %c0_i32_12, %c256_i32 : i32
      %28 = tpu.assume_multiple %27, 256 : i32
      %c0_13 = arith.constant 0 : index
      %c0_14 = arith.constant 0 : index
      %29 = arith.index_cast %28 : i32 to index
      %30 = vector.load %arg3[%c0_13, %c0_14, %29] : memref<1x19x256xf32, #tpu.memory_space<vmem>>, vector<1x19x256xf32>
      %31 = vector.shape_cast %30 : vector<1x19x256xf32> to vector<19x256xf32>
      %c0_15 = arith.constant 0 : index
      %c0_16 = arith.constant 0 : index
      %32 = arith.index_cast %28 : i32 to index
      %33 = vector.load %arg4[%c0_15, %c0_16, %32] : memref<1x19x256xf32, #tpu.memory_space<vmem>>, vector<1x19x256xf32>
      %34 = vector.shape_cast %33 : vector<1x19x256xf32> to vector<19x256xf32>
      %c0_17 = arith.constant 0 : index
      %c0_18 = arith.constant 0 : index
      %35 = arith.index_cast %28 : i32 to index
      %36 = vector.load %arg5[%c0_17, %c0_18, %35] : memref<1x1x256xi32, #tpu.memory_space<vmem>>, vector<1x1x256xi32>
      %37 = vector.shape_cast %36 : vector<1x1x256xi32> to vector<1x256xi32>
      %38 = vector.broadcast %37 : vector<1x256xi32> to vector<19x256xi32>
      %39 = arith.cmpi eq, %38, %0 : vector<19x256xi32>
      %40 = arith.extui %39 : vector<19x256xi1> to vector<19x256xi32>
      %41 = arith.sitofp %40 : vector<19x256xi32> to vector<19x256xf32>
      %cst_19 = arith.constant dense<0.000000e+00> : vector<19x256xf32>
      %42 = tpu.matmul %17, %31, %cst_19 {dimension_numbers = #tpu.dot_dimension_numbers<[1], [0], [0], [1], [0, 0, 1, 1], [], []>, precision = #tpu.contract_precision<fp32>} : vector<19x19xf32>, vector<19x256xf32>, vector<19x256xf32> -> vector<19x256xf32>
      %cst_20 = arith.constant dense<0.000000e+00> : vector<19x256xf32>
      %43 = tpu.matmul %20, %34, %cst_20 {dimension_numbers = #tpu.dot_dimension_numbers<[1], [0], [0], [1], [0, 0, 1, 1], [], []>, precision = #tpu.contract_precision<fp32>} : vector<19x19xf32>, vector<19x256xf32>, vector<19x256xf32> -> vector<19x256xf32>
      %44 = arith.mulf %41, %42 : vector<19x256xf32>
      %cst_21 = arith.constant dense<0.000000e+00> : vector<256xf32>
      %45 = vector.multi_reduction <add>, %44, %cst_21 [0] : vector<19x256xf32> to vector<256xf32>
      %46 = vector.shape_cast %45 : vector<256xf32> to vector<1x256xf32>
      %47 = arith.mulf %41, %43 : vector<19x256xf32>
      %cst_22 = arith.constant dense<0.000000e+00> : vector<256xf32>
      %48 = vector.multi_reduction <add>, %47, %cst_22 [0] : vector<19x256xf32> to vector<256xf32>
      %49 = vector.shape_cast %48 : vector<256xf32> to vector<1x256xf32>
      %50 = vector.broadcast %23 : vector<19x1xf32> to vector<19x256xf32>
      %51 = arith.mulf %41, %50 : vector<19x256xf32>
      %cst_23 = arith.constant dense<0.000000e+00> : vector<256xf32>
      %52 = vector.multi_reduction <add>, %51, %cst_23 [0] : vector<19x256xf32> to vector<256xf32>
      %53 = vector.shape_cast %52 : vector<256xf32> to vector<1x256xf32>
      %54 = vector.broadcast %26 : vector<19x1xf32> to vector<19x256xf32>
      %55 = arith.mulf %41, %54 : vector<19x256xf32>
      %cst_24 = arith.constant dense<0.000000e+00> : vector<256xf32>
      %56 = vector.multi_reduction <add>, %55, %cst_24 [0] : vector<19x256xf32> to vector<256xf32>
      %57 = vector.shape_cast %56 : vector<256xf32> to vector<1x256xf32>
      %58 = arith.mulf %31, %31 : vector<19x256xf32>
      %cst_25 = arith.constant dense<0.000000e+00> : vector<256xf32>
      %59 = vector.multi_reduction <add>, %58, %cst_25 [0] : vector<19x256xf32> to vector<256xf32>
      %60 = vector.shape_cast %59 : vector<256xf32> to vector<1x256xf32>
      %61 = arith.mulf %34, %34 : vector<19x256xf32>
      %cst_26 = arith.constant dense<0.000000e+00> : vector<256xf32>
      %62 = vector.multi_reduction <add>, %61, %cst_26 [0] : vector<19x256xf32> to vector<256xf32>
      %63 = vector.shape_cast %62 : vector<256xf32> to vector<1x256xf32>
      %64 = arith.mulf %60, %53 : vector<1x256xf32>
      %65 = math.sqrt %64 : vector<1x256xf32>
      %cst_27 = arith.constant 9.99999993E-9 : f32
      %66 = vector.broadcast %cst_27 : f32 to vector<1x256xf32>
      %67 = arith.maximumf %65, %66 : vector<1x256xf32>
      %68 = arith.divf %46, %67 : vector<1x256xf32>
      %69 = arith.mulf %63, %57 : vector<1x256xf32>
      %70 = math.sqrt %69 : vector<1x256xf32>
      %cst_28 = arith.constant 9.99999993E-9 : f32
      %71 = vector.broadcast %cst_28 : f32 to vector<1x256xf32>
      %72 = arith.maximumf %70, %71 : vector<1x256xf32>
      %73 = arith.divf %49, %72 : vector<1x256xf32>
      %74 = arith.subf %68, %73 : vector<1x256xf32>
      %75 = arith.mulf %74, %74 : vector<1x256xf32>
      %76 = vector.shape_cast %75 : vector<1x256xf32> to vector<1x1x256xf32>
      %cst_29 = arith.constant dense<0.000000e+00> : vector<1xf32>
      %77 = vector.multi_reduction <add>, %76, %cst_29 [1, 2] : vector<1x1x256xf32> to vector<1xf32>
      %78 = vector.shape_cast %77 : vector<1xf32> to vector<1x1x1xf32>
      %79 = vector.extract %78[0, 0, 0] : f32 from vector<1x1x1xf32>
      %c0_30 = arith.constant 0 : index
      %c0_31 = arith.constant 0 : index
      %c0_32 = arith.constant 0 : index
      %80 = vector.load %arg6[%c0_30, %c0_31, %c0_32] : memref<1x1x128xf32, #tpu.memory_space<vmem>>, vector<1x1x128xf32>
      %81 = vector.shape_cast %80 : vector<1x1x128xf32> to vector<1x128xf32>
      %82 = vector.broadcast %79 : f32 to vector<1x128xf32>
      %83 = arith.addf %81, %82 : vector<1x128xf32>
      %c0_33 = arith.constant 0 : index
      %c0_34 = arith.constant 0 : index
      %c0_35 = arith.constant 0 : index
      %84 = vector.load %arg6[%c0_33, %c0_34, %c0_35] : memref<1x1x128xf32, #tpu.memory_space<vmem>>, vector<1x1x128xf32>
      %85 = vector.shape_cast %84 : vector<1x1x128xf32> to vector<1x128xf32>
      %86 = vector.shape_cast %83 : vector<1x128xf32> to vector<1x1x128xf32>
      tpu.vector_store %arg6[%c0_33, %c0_34, %c0_35], %86 {strides = array<i32>} : memref<1x1x128xf32, #tpu.memory_space<vmem>>, vector<1x1x128xf32>,
      %c1_i32_36 = arith.constant 1 : i32
    } else {
    }
    return
  }
  func.func @transform_0(%arg0: i32, %arg1: i32, %arg2: i32) -> (i32, i32, i32) {
    %c0_i32 = arith.constant 0 : i32
    %c0_i32_0 = arith.constant 0 : i32
    return %arg0, %c0_i32, %arg2 : i32, i32, i32
  }
  func.func @transform_1(%arg0: i32, %arg1: i32, %arg2: i32) -> (i32, i32, i32) {
    %c0_i32 = arith.constant 0 : i32
    %c0_i32_0 = arith.constant 0 : i32
    return %arg0, %c0_i32, %arg2 : i32, i32, i32
  }
  func.func @transform_2(%arg0: i32, %arg1: i32, %arg2: i32) -> (i32, i32, i32) {
    %c0_i32 = arith.constant 0 : i32
    %c0_i32_0 = arith.constant 0 : i32
    return %arg0, %c0_i32, %arg2 : i32, i32, i32
  }
  func.func @transform_3(%arg0: i32, %arg1: i32, %arg2: i32) -> (i32, i32, i32) {
    %c0_i32 = arith.constant 0 : i32
    %c0_i32_0 = arith.constant 0 : i32
    %c0_i32_1 = arith.constant 0 : i32
    return %arg0, %c0_i32, %c0_i32_0 : i32, i32, i32
  }
}

</mosaic_0001>

<bundles_post_ra>
// kernel: tpu_custom_call.1
= control target key start
LH: loop header
LB: loop body
LE: loop exit
PB: predicated region body
PF: predicated region fallthrough
CT: control target
= control target key end

     0   :  { %8 = vsyncpa [#allocation6], 0  ;;  %s3990_s0 = inlined_call_operand.vmem [shape: f32[2,19,256], index: 0, kind: input, shape index: {}]   ;;  %s3991_s1 = inlined_call_operand.vmem [shape: f32[2,19,256], index: 1, kind: input, shape index: {}]   ;;  %s3992_s2 = inlined_call_operand.vmem [shape: s32[2,1,256], index: 2, kind: input, shape index: {}]   ;;  %s3993_s3 = inlined_call_operand.hbm [shape: f32[2,1,128], index: 3, kind: output, shape index: {}]  }
   0x1   :  { %10 = vsyncpa [#allocation6 + $0x1], 0  ;;  %s3104_s12 = smov 0   ;;  %s3106_s13 = smov 0  }
   0x2   :  { %s3108_s14 = smov 0   ;;  %s3110_s15 = smov 0  }
   0x3   :  { %s3112_s16 = smov 0   ;;  %s3114_s17 = smov 0  }
   0x4   :  { %s3116_s18 = smov 0   ;;  %s3118_s19 = smov 0  }
   0x5 LB: > { %s2818_s20 = sadd.s32 4294967295, %s3077_s19   ;;  %s2819_s21 = sadd.s32 4294967294, %s3077_s19   ;;  %s3077_s19 = sphi %s3118_s19, %s16_s19   ;;  %s3073_s18 = sphi %s3116_s18, %s4018_s18   ;;  %s3069_s17 = sphi %s3114_s17, %s4017_s17   ;;  %s3065_s16 = sphi %s3112_s16, %s4016_s16   ;;  %s3061_s15 = sphi %s3110_s15, %s4015_s15   ;;  %s3057_s14 = sphi %s3108_s14, %s4014_s14   ;;  %s3053_s13 = sphi %s3106_s13, %s4013_s13   ;;  %s3049_s12 = sphi %s3104_s12, %s4012_s12  }
   0x6   : > { %s31_s22 = sadd.s32 1, %s3069_s17  ;;  %s35_s23 = sadd.s32 1, %s3073_s18 }
   0x7   : > { %p33_p0 = scmp.ge.s32.totalorder %s31_s22, 2  ;;  %p136_p1 = scmp.ne.s32.totalorder %s3057_s14, %s3053_s13 }
   0x8   : > { %p137_p2 = scmp.eq.s32.totalorder %s2818_s20, 3  ;;  %p142_p4 = scmp.ne.s32.totalorder %s3053_s13, %s3049_s12 }
   0x9   : > { %s4020_s22 = smov (%p33_p0, %s31_s22), 0  ;;  %s4022_s23 = smov (!%p33_p0, %s35_s23), %s3073_s18 }
   0xa   : > { %p3153_p3 = por %p137_p2, %p136_p1  ;;  %p37_p5 = scmp.ge.s32.totalorder %s4022_s23, 2 }
   0xb   : > { %p143_p6 = scmp.eq.s32.totalorder %s2819_s21, 3  ;;  %p2822_p7 = scmp.ge.s32.totalorder %s3077_s19, 1 }
   0xc   : > { %p199_p8 = scmp.lt.s32.totalorder %s3077_s19, 5  ;;  %s4024_s23 = smov (%p37_p5, %s4022_s23), 0 }
   0xd   : > { %p3163_p9 = por %p143_p6, %p142_p4  ;;  %s123_s26 = ssub.s32 %s3073_s18, %s4024_s23 }
   0xe   : > { %p200_p10 = pnand %p2822_p7, %p199_p8  ;;  %s126_s27 = sadd.s32 1, %s3057_s14 }
   0xf   : > { %p124_p11 = scmp.eq.s32.totalorder %s123_s26, 0  ;;  %s241_s29 = sand.u32 (!%p200_p10), 1, %s3053_s13  }
  0x10   : > { %203 = sbr.rel (%p200_p10) target bundleno = 980 (0x3d4), region = 32  ;;  %p244_p12 = scmp.lt.s32.totalorder (!%p200_p10), %s3065_s16, 1 }
  0x11   : > { %s3171_s28 = scalar_select %p124_p11, %s3057_s14, %s126_s27  }
  0x12   : > { %p276_p13 = scmp.eq.s32.totalorder (!%p200_p10), %s3061_s15, 0  ;;  %s3202_s27 = scalar_lea.vmem (!%p200_p10), [#allocation5], %s241_s29 }
  0x15   : > { %v272_v0 = vlaneseq  ;;  %s245_s30 = scalar_select %p244_p12, %s3065_s16, 1  ;;  %vm283_vm0 = vcmask (%p276_p13), 154624   ;;  %v3079_v4 = vmov (%p276_p13), 0.0   ;;  %vm286_vm1 = vcmask (%p276_p13), 149504  }
  0x16   : > { %281 = sbr.rel (!%p276_p13) target bundleno = 32 (0x20), region = 36  ;;  %282 = vst [vmem:[%s3202_s27] sm:$0x1] (%p276_p13), %v3079_v4  ;;  %vm291_vm2 = vcmask (%p276_p13), 7168   ;;  %vm294_vm3 = vcmask (%p276_p13), 2048  }
  0x17   : > { %v3177_v1 = vshrl.u32 %v272_v0, 7  ;;  %s2880_s4 = smul.u32 48, %s245_s30  ;;  %s2825_s5 = sshll.u32 %s245_s30, 1  ;;  %284 = vst.msk [vmem:[#allocation2] sm:$0xff] (%p276_p13), %vm283_vm0, %v3079_v4 }
  0x18   : > { %s3188_s8 = scalar_lea.vmem %s3992_s2, %s2825_s5  ;;  %285 = vst.msk [vmem:[#allocation2 + $0x8] sm:$0xff] (%p276_p13), %vm283_vm0, %v3079_v4 }
  0x19   : > { %v3180_v2 = vadd.s32 8, %v3177_v1  ;;  %v3183_v3 = vadd.s32 16, %v3177_v1  ;;  %s3193_s11 = scalar_lea.vmem %s3990_s0, %s2880_s4  ;;  %s3198_s26 = scalar_lea.vmem %s3991_s1, %s2880_s4  ;;  %288 = vst.msk [vmem:[#allocation3] sm:$0xff] (%p276_p13), %vm283_vm0, %v3079_v4 }
  0x1a   : > { %289 = vst.msk [vmem:[#allocation3 + $0x8] sm:$0xff] (%p276_p13), %vm283_vm0, %v3079_v4 }
  0x1b   : > { %287 = vst.msk [vmem:[#allocation2 + $0x10] sm:$0x7] %vm286_vm1, %v3079_v4 }
  0x1c   : > { %290 = vst.msk [vmem:[#allocation3 + $0x10] sm:$0x7] %vm286_vm1, %v3079_v4 }
  0x1d   : > { %292 = vst.msk [vmem:[#allocation4] sm:$0xff] %vm291_vm2, %v3079_v4 }
  0x1e   : > { %293 = vst.msk [vmem:[#allocation4 + $0x8] sm:$0xff] %vm291_vm2, %v3079_v4 }
  0x1f   : > { %295 = vst.msk [vmem:[#allocation4 + $0x10] sm:$0x7] %vm294_vm3, %v3079_v4 }
  0x20 PF: > { %p2827_p0 = scmp.ne.s32.totalorder %s3061_s15, 0 }
  0x22   : > { %298 = sbr.rel (%p2827_p0) target bundleno = 332 (0x14c), region = 40 }
  0x27   : > { %v303_v5 = vld [vmem:[%s3193_s11 + $0x20] sm:$0x7]  ;;  %v301_v6 = vld [vmem:[%s3193_s11 + $0x10] sm:$0xff]  ;;  %v302_v12 = vld [vmem:[%s3193_s11 + $0x18] sm:$0xff]  ;;  %v3080_v24 = vmov 0.0   ;;  %v3081_v63 = vmov 1.0  }
  0x28   : > { %v299_v7 = vld [vmem:[%s3193_s11] sm:$0xff]  ;;  %v3209_v8 = vand.u32 4294901760, %v303_v5  ;;  %v3211_v9 = vand.u32 4294901760, %v301_v6  ;;  %v304_v14 = vld [vmem:[%s3193_s11 + $0x28] sm:$0x7]  ;;  %v3218_v15 = vand.u32 4294901760, %v302_v12 }
  0x29   : > { %v3213_v10 = vand.u32 4294901760, %v299_v7  ;;  %v311_v11 = vld [vmem:[%s3188_s8] sm:$0x3]  ;;  %v3227_v19 = vand.u32 4294901760, %v304_v14  ;;  %v300_v38 = vld [vmem:[%s3193_s11 + $0x8] sm:$0xff]  ;;  %vm1297_vm10 = vcmask 1042432  }
  0x2a   : > { %v312_v13 = vperm.slane %v311_v11, 0  ;;  %349 = vmatpush.xpose.msra.mxu0 %v3209_v8  ;;  %v393_v16 = vsub.f32 %v303_v5, %v3209_v8  ;;  %475 = vmatpush.xpose.msra.mxu3 %v3209_v8  ;;  %v399_v17 = vsub.f32 %v301_v6, %v3211_v9  ;;  %v3240_v22 = vsub.f32 %v302_v12, %v3218_v15 }
  0x2b   : > { %v3225_v18 = vsub.f32 %v299_v7, %v3213_v10  ;;  %v3252_v28 = vsub.f32 %v304_v14, %v3227_v19  ;;  %v3290_v46 = vand.u32 4294901760, %v300_v38  ;;  %v313_v51 = vperm.slane %v311_v11, 1  ;;  %v309_v11 = vld [vmem:[%s3198_s26 + $0x20] sm:$0x7] }
  0x2c   : > { %vm3230_vm4 = vcmp.eq.s32.totalorder %v312_v13, %v3177_v1  ;;  %vm3235_vm5 = vcmp.eq.s32.totalorder %v312_v13, %v3180_v2  ;;  %438 = vmatpush.xpose.msra.mxu2 %v393_v16  ;;  %v394_v23 = vand.u32 4294901760, %v393_v16  ;;  %v400_v26 = vand.u32 4294901760, %v399_v17 }
  0x2d   : > { %v3245_v25 = vsel %vm3230_vm4, 1.0, %v3080_v24  ;;  %v3257_v29 = vsel %vm3235_vm5, 1.0, %v3080_v24  ;;  %v406_v32 = vand.u32 4294901760, %v3225_v18  ;;  %vm3263_vm6 = vcmp.eq.s32.totalorder %v312_v13, %v3183_v3 }
  0x2e   : > { %v3249_v27 = vsub.f32 %v3245_v25, %v3245_v25  ;;  %351 = vmatpush.xpose.msra.mxu0 %v3211_v9  ;;  %v395_v30 = vsub.f32 %v393_v16, %v394_v23  ;;  %477 = vmatpush.xpose.msra.mxu3 %v3211_v9  ;;  %v401_v31 = vsub.f32 %v399_v17, %v400_v26  ;;  %v628_v35 = vand.u32 4294901760, %v3252_v28 }
  0x2f   : > { %v3273_v36 = vsub.f32 %v3257_v29, %v3257_v29  ;;  %v634_v37 = vand.u32 4294901760, %v3240_v22  ;;  %v407_v44 = vsub.f32 %v3225_v18, %v406_v32  ;;  %v3288_v45 = vsel %vm3263_vm6, 1.0, %v3080_v24 }
  0x30   : > { %v3268_v34 = vand.u32 4294901760, %v3249_v27  ;;  %v396_v39 = vand.u32 4294901760, %v395_v30  ;;  %441 = vmatpush.xpose.msra.mxu2 %v399_v17  ;;  %v629_v41 = vsub.f32 %v3252_v28, %v628_v35  ;;  %v402_v43 = vand.u32 4294901760, %v401_v31 }
  0x31   : > { %v3281_v42 = vand.u32 4294901760, %v3273_v36  ;;  %v635_v49 = vsub.f32 %v3240_v22, %v634_v37  ;;  %v639_v50 = vsub.f32 %v300_v38, %v3290_v46  ;;  %v3306_v53 = vsub.f32 %v3288_v45, %v3288_v45 }
  0x32   : > { %v357_v40 = vsub.f32 %v3249_v27, %v3268_v34  ;;  %353 = vmatpush.xpose.msra.mxu0 %v3213_v10  ;;  %397 = vmatpush.xpose.msra.mxu1 %v396_v39  ;;  %v630_v48 = vand.u32 4294901760, %v629_v41  ;;  %v408_v54 = vand.u32 4294901760, %v407_v44  ;;  %vm3317_vm7 = vcmp.eq.s32.totalorder %v313_v51, %v3177_v1  ;;  %v305_v39 = vld [vmem:[%s3198_s26] sm:$0xff] }
  0x33   : > { %479 = vmatpush.xpose.msra.mxu3 %v3213_v10  ;;  %v365_v52 = vsub.f32 %v3273_v36, %v3281_v42  ;;  %v640_v55 = vand.u32 4294901760, %v639_v50  ;;  %v636_v56 = vand.u32 4294901760, %v635_v49  ;;  %v3314_v59 = vand.u32 4294901760, %v3306_v53  ;;  %v310_v49 = vld [vmem:[%s3198_s26 + $0x28] sm:$0x7] }
  0x34   : > { %v3292_v47 = vand.u32 4294901760, %v357_v40  ;;  %444 = vmatpush.xpose.msra.mxu2 %v3225_v18  ;;  %v3325_v62 = vsel %vm3317_vm7, 1.0, %v3080_v24  ;;  %vm3346_vm8 = vcmp.eq.s32.totalorder %v313_v51, %v3180_v2  ;;  %v3378_v12 = vand.u32 4294901760, %v309_v11 }
  0x35   : > { %v641_v57 = vsub.f32 %v639_v50, %v640_v55  ;;  %v3310_v58 = vand.u32 4294901760, %v365_v52  ;;  %v373_v0 = vsub.f32 %v3306_v53, %v3314_v59  ;;  %v3339_v4 = vsub.f32 %v3325_v62, %v3325_v62 }
  0x36   : > { %515 = vmatpush.xpose.msrb.mxu0 %v394_v23  ;;  %403 = vmatpush.xpose.msra.mxu1 %v402_v43  ;;  %vm3381_vm9 = vcmp.eq.s32.totalorder %v313_v51, %v3183_v3  ;;  %v872_v14 = vsub.f32 %v309_v11, %v3378_v12  ;;  %v831_v40 = vand.u32 4294901760, %v305_v39  ;;  %v1061_v51 = vand.u32 4294901760, %v310_v49  ;;  %v306_v11 = vld [vmem:[%s3198_s26 + $0x8] sm:$0xff] }
  0x37   : > { %359 = vmatmul.f32.vlgmr.msra.gmra.mxu0 %v3292_v47  ;;  %483 = vmatmul.f32.vlgmr.msra.gmra.mxu3 %v3268_v34  ;;  %v642_v61 = vand.u32 4294901760, %v641_v57  ;;  %v3341_v5 = vand.u32 4294901760, %v373_v0  ;;  %v3352_v7 = vand.u32 4294901760, %v3339_v4  ;;  %v1291_v20 = vadd.f32 %v3325_v62, %v3245_v25 }
  0x38   : > { %583 = vmatpush.xpose.msrb.mxu2 %v3227_v19  ;;  %631 = vmatpush.xpose.msrb.mxu3 %v630_v48  ;;  %v873_v18 = vand.u32 4294901760, %v872_v14  ;;  %v884_v43 = vsub.f32 %v305_v39, %v831_v40  ;;  %v1106_v52 = vsub.f32 %v310_v49, %v1061_v51  ;;  %vm806_vm11 = vcmask 154624  }
  0x39   : > { %447 = vmatmul.f32.vlgmr.msra.gmra.mxu2 %v3249_v27  ;;  %1292 = vadd.xlane.f32.xlu0 %v1291_v20  ;;  %vm809_vm12 = vcmask 149504   ;;  %vm1306_vm13 = vcmask 7168   ;;  %vm1309_vm14 = vcmask 2048  }
  0x3a   : > { %519 = vmatpush.xpose.msrb.mxu0 %v400_v26  ;;  %409 = vmatpush.xpose.msra.mxu1 %v408_v54  ;;  %v874_v23 = vsub.f32 %v872_v14, %v873_v18  ;;  %v1107_v54 = vand.u32 4294901760, %v1106_v52 }
  0x3c   : > { %585 = vmatpush.xpose.msrb.mxu2 %v3218_v15  ;;  %637 = vmatpush.xpose.msrb.mxu3 %v636_v56  ;;  %v308_v56 = vld [vmem:[%s3198_s26 + $0x18] sm:$0xff] }
  0x3d   : > { %2834 = vmatmul.msk.f32.vlgmr.msra.gmra.mxu1 %vm3230_vm4, %v3081_v63 }
  0x3e   : > { %551 = vmatpush.xpose.msrb.mxu1 %v3209_v8  ;;  %523 = vmatpush.xpose.msrb.mxu0 %v406_v32  ;;  %v3358_v8 = vsel %vm3346_vm8, 1.0, %v3080_v24 }
  0x3f   : > { %367 = vmatmul.f32.gmra.mxu0 %v3310_v58  ;;  %489 = vmatmul.f32.gmra.mxu3 %v3281_v42  ;;  %v1294_v33 = vadd.f32 %v3358_v8, %v3257_v29 }
  0x40   : > { %587 = vmatpush.xpose.msrb.mxu2 %v3290_v46  ;;  %643 = vmatpush.xpose.msrb.mxu3 %v642_v61  ;;  %v1063_v61 = vand.u32 4294901760, %v308_v56 }
  0x41   : > { %452 = vmatmul.f32.gmra.mxu2 %v3273_v36  ;;  %1295 = vadd.xlane.f32.xlu0 %v1294_v33 }
  0x42   : > { %553 = vmatpush.xpose.msrb.mxu1 %v3211_v9  ;;  %672 = vmatpush.xpose.msra.mxu0 %v3252_v28  ;;  %v591_v9 = vsub.f32 %v3339_v4, %v3352_v7  ;;  %v875_v28 = vand.u32 4294901760, %v874_v23  ;;  %v1112_v0 = vsub.f32 %v308_v56, %v1063_v61 }
  0x44   : > { %749 = vmatpush.xpose.msra.mxu2 %v628_v35  ;;  %785 = vmatpush.xpose.msra.mxu3 %v3227_v19  ;;  %v3386_v16 = vand.u32 4294901760, %v591_v9  ;;  %v1113_v9 = vand.u32 4294901760, %v1112_v0 }
  0x45   : > { %2835 = vmatmul.msk.f32.gmra.mxu1 %vm3235_vm5, %v3081_v63 }
  0x46   : > { %555 = vmatpush.xpose.msrb.mxu1 %v3213_v10  ;;  %675 = vmatpush.xpose.msra.mxu0 %v3240_v22  ;;  %v3373_v10 = vsub.f32 %v3358_v8, %v3358_v8 }
  0x47   : > { %375 = vmatmul.f32.gmra.mxu0 %v3341_v5  ;;  %495 = vmatmul.f32.gmra.mxu3 %v3314_v59 }
  0x48   : > { %753 = vmatpush.xpose.msra.mxu2 %v634_v37  ;;  %787 = vmatpush.xpose.msra.mxu3 %v3218_v15  ;;  %v3389_v17 = vand.u32 4294901760, %v3373_v10 }
  0x49   : > { %457 = vmatmul.f32.gmra.mxu2 %v3306_v53 }
  0x4a   : > { %709 = vmatpush.xpose.msra.mxu1 %v3227_v19  ;;  %678 = vmatpush.xpose.msra.mxu0 %v639_v50  ;;  %v599_v19 = vsub.f32 %v3373_v10, %v3389_v17 }
  0x4c   : > { %757 = vmatpush.xpose.msra.mxu2 %v640_v55  ;;  %789 = vmatpush.xpose.msra.mxu3 %v3290_v46  ;;  %v3421_v31 = vand.u32 4294901760, %v599_v19  ;;  %v1108_v55 = vsub.f32 %v1106_v52, %v1107_v54 }
  0x4d   : > { %2836 = vmatmul.msk.f32.gmra.mxu1 %vm3263_vm6, %v3081_v63 }
  0x4e   : > { %711 = vmatpush.xpose.msra.mxu1 %v3218_v15  ;;  %v3395_v15 = vsel %vm3381_vm9, 1.0, %v3080_v24  ;;  %v307_v24 = vld [vmem:[%s3198_s26 + $0x10] sm:$0xff]  ;;  %v1109_v57 = vand.u32 4294901760, %v1108_v55 }
  0x4f   : > { %2837 = vmatmul.msk.f32.vlgmr.msrb.gmra.mxu0 %vm3230_vm4, %v3081_v63  ;;  %2843 = vmatmul.msk.f32.vlgmr.msrb.gmra.mxu3 %vm3317_vm7, %v3081_v63  ;;  %v3413_v22 = vsub.f32 %v3395_v15, %v3395_v15  ;;  %v3417_v26 = vand.u32 4294901760, %v307_v24  ;;  %v1299_v25 = vsel %vm1297_vm10, %v3395_v15, 0.0 }
  0x50   : > { %828 = vmatpush.xpose.msrb.mxu0 %v3378_v12  ;;  %954 = vmatpush.xpose.msrb.mxu3 %v3378_v12 }
  0x51   : > { %593 = vmatmul.f32.vlgmr.msrb.gmra.mxu2 %v3386_v16  ;;  %v878_v30 = vsub.f32 %v307_v24, %v3417_v26  ;;  %v3424_v32 = vand.u32 4294901760, %v3413_v22 }
  0x52   : > { %713 = vmatpush.xpose.msra.mxu1 %v3290_v46  ;;  %917 = vmatpush.xpose.msrb.mxu2 %v872_v14  ;;  %v885_v46 = vand.u32 4294901760, %v884_v43  ;;  %v1114_v14 = vsub.f32 %v1112_v0, %v1113_v9 }
  0x53   : > { %v879_v35 = vand.u32 4294901760, %v878_v30  ;;  %v607_v37 = vsub.f32 %v3413_v22, %v3424_v32 }
  0x54   : > { %830 = vmatpush.xpose.msrb.mxu0 %v3417_v26  ;;  %956 = vmatpush.xpose.msrb.mxu3 %v3417_v26  ;;  %v886_v48 = vsub.f32 %v884_v43, %v885_v46  ;;  %v1115_v19 = vand.u32 4294901760, %v1114_v14  ;;  %v332_v14 = vld [vmem:[#allocation2] sm:$0xff] }
  0x55   : > { %2840 = vmatmul.msk.f32.vlgmr.msrb.gmra.mxu1 %vm3230_vm4, %v3081_v63  ;;  %v880_v38 = vsub.f32 %v878_v30, %v879_v35  ;;  %v3440_v44 = vand.u32 4294901760, %v607_v37 }
  0x56   : > { %920 = vmatpush.xpose.msrb.mxu2 %v878_v30  ;;  %876 = vmatpush.xpose.msrb.mxu1 %v875_v28  ;;  %v887_v50 = vand.u32 4294901760, %v886_v48 }
  0x57   : > { %2838 = vmatmul.msk.f32.gmra.mxu0 %vm3235_vm5, %v3081_v63  ;;  %2844 = vmatmul.msk.f32.gmra.mxu3 %vm3346_vm8, %v3081_v63  ;;  %v881_v41 = vand.u32 4294901760, %v880_v38 }
  0x58   : > { %832 = vmatpush.xpose.msrb.mxu0 %v831_v40  ;;  %958 = vmatpush.xpose.msrb.mxu3 %v831_v40 }
  0x59   : > { %601 = vmatmul.f32.gmra.mxu2 %v3421_v31 }
  0x5a   : > { %882 = vmatpush.xpose.msrb.mxu1 %v881_v41  ;;  %923 = vmatpush.xpose.msrb.mxu2 %v884_v43 }
  0x5d   : > { %2841 = vmatmul.msk.f32.gmra.mxu1 %vm3235_vm5, %v3081_v63 }
  0x5e   : > { %888 = vmatpush.xpose.msrb.mxu1 %v887_v50 }
  0x5f   : > { %2839 = vmatmul.msk.f32.gmra.mxu0 %vm3263_vm6, %v3081_v63  ;;  %2845 = vmatmul.msk.f32.gmra.mxu3 %vm3381_vm9, %v3081_v63 }
  0x61   : > { %609 = vmatmul.f32.gmra.mxu2 %v3440_v44 }
  0x65   : > { %2842 = vmatmul.msk.f32.gmra.mxu1 %vm3263_vm6, %v3081_v63 }
  0x67   : > { %681 = vmatmul.f32.vlgmr.msra.gmra.mxu0 %v3339_v4  ;;  %2849 = vmatmul.msk.f32.vlgmr.msra.gmra.mxu3 %vm3317_vm7, %v3081_v63 }
  0x68   : > { %994 = vmatpush.xpose.msra.mxu0 %v873_v18  ;;  %1110 = vmatpush.xpose.msra.mxu3 %v1109_v57  ;;  %v1065_v18 = vand.u32 4294901760, %v306_v11 }
  0x69   : > { %2846 = vmatmul.msk.f32.vlgmr.msra.gmra.mxu2 %vm3317_vm7, %v3081_v63 }
  0x6a   : > { %1062 = vmatpush.xpose.msra.mxu2 %v1061_v51  ;;  %v1118_v23 = vsub.f32 %v306_v11, %v1065_v18 }
  0x6c   : > { %998 = vmatpush.xpose.msra.mxu0 %v879_v35  ;;  %1116 = vmatpush.xpose.msra.mxu3 %v1115_v19  ;;  %v1119_v24 = vand.u32 4294901760, %v1118_v23 }
  0x6d   : > { %717 = vmatmul.f32.vlgmr.msra.gmra.mxu1 %v3352_v7 }
  0x6e   : > { %1064 = vmatpush.xpose.msra.mxu2 %v1063_v61  ;;  %1030 = vmatpush.xpose.msra.mxu1 %v3378_v12  ;;  %v1120_v28 = vsub.f32 %v1118_v23, %v1119_v24 }
  0x6f   : > { %686 = vmatmul.f32.gmra.mxu0 %v3373_v10  ;;  %2850 = vmatmul.msk.f32.gmra.mxu3 %vm3346_vm8, %v3081_v63 }
  0x70   : > { %1002 = vmatpush.xpose.msra.mxu0 %v885_v46  ;;  %v1121_v12 = vand.u32 4294901760, %v1120_v28 }
  0x71   : > { %2847 = vmatmul.msk.f32.gmra.mxu2 %vm3346_vm8, %v3081_v63 }
  0x72   : > { %1066 = vmatpush.xpose.msra.mxu2 %v1065_v18  ;;  %1032 = vmatpush.xpose.msra.mxu1 %v3417_v26 }
  0x73   : > { %1122 = vmatpush.xpose.msra.mxu3 %v1121_v12 }
  0x75   : > { %723 = vmatmul.f32.gmra.mxu1 %v3389_v17 }
  0x76   : > { %1034 = vmatpush.xpose.msra.mxu1 %v831_v40 }
  0x77   : > { %691 = vmatmul.f32.gmra.mxu0 %v3413_v22  ;;  %2851 = vmatmul.msk.f32.gmra.mxu3 %vm3381_vm9, %v3081_v63 }
  0x79   : > { %2848 = vmatmul.msk.f32.gmra.mxu2 %vm3381_vm9, %v3081_v63 }
  0x7d   : > { %729 = vmatmul.f32.gmra.mxu1 %v3424_v32 }
  0x7f   : > { %838 = vmatmul.f32.vlgmr.msrb.gmra.mxu0 %v3292_v47  ;;  %962 = vmatmul.f32.vlgmr.msrb.gmra.mxu3 %v3268_v34 }
  0x80   : > { %1151 = vmatpush.xpose.msrb.mxu0 %v1106_v52  ;;  %1264 = vmatpush.xpose.msrb.mxu3 %v1061_v51 }
  0x81   : > { %926 = vmatmul.f32.vlgmr.msrb.gmra.mxu2 %v3249_v27  ;;  %v1298_v27 = vsel %vm1297_vm10, %v3288_v45, 0.0 }
  0x82   : > { %1228 = vmatpush.xpose.msrb.mxu2 %v1107_v54  ;;  %v1300_v34 = vadd.f32 %v1299_v25, %v1298_v27 }
  0x84   : > { %1154 = vmatpush.xpose.msrb.mxu0 %v1112_v0  ;;  %1266 = vmatpush.xpose.msrb.mxu3 %v1063_v61 }
  0x85   : > { %2852 = vmatmul.msk.f32.vlgmr.msrb.gmra.mxu1 %vm3230_vm4, %v3081_v63  ;;  %1301 = vadd.xlane.f32.xlu1 %v1300_v34 }
  0x86   : > { %1232 = vmatpush.xpose.msrb.mxu2 %v1113_v9  ;;  %1188 = vmatpush.xpose.msrb.mxu1 %v1061_v51 }
  0x87   : > { %846 = vmatmul.f32.gmra.mxu0 %v3310_v58  ;;  %968 = vmatmul.f32.gmra.mxu3 %v3281_v42 }
  0x88   : > { %1157 = vmatpush.xpose.msrb.mxu0 %v1118_v23  ;;  %1268 = vmatpush.xpose.msrb.mxu3 %v1065_v18 }
  0x89   : > { %931 = vmatmul.f32.gmra.mxu2 %v3273_v36 }
  0x8a   : > { %1236 = vmatpush.xpose.msrb.mxu2 %v1119_v24  ;;  %1190 = vmatpush.xpose.msrb.mxu1 %v1063_v61 }
  0x8d   : > { %2853 = vmatmul.msk.f32.gmra.mxu1 %vm3235_vm5, %v3081_v63 }
  0x8e   : > { %1192 = vmatpush.xpose.msrb.mxu1 %v1065_v18 }
  0x8f   : > { %854 = vmatmul.f32.gmra.mxu0 %v3341_v5  ;;  %974 = vmatmul.f32.gmra.mxu3 %v3314_v59 }
  0x91   : > { %936 = vmatmul.f32.gmra.mxu2 %v3306_v53 }
  0x95   : > { %2854 = vmatmul.msk.f32.gmra.mxu1 %vm3263_vm6, %v3081_v63 }
  0x97   : > { %2855 = vmatmul.msk.f32.vlgmr.msra.gmra.mxu0 %vm3230_vm4, %v3081_v63  ;;  %2861 = vmatmul.msk.f32.vlgmr.msra.gmra.mxu3 %vm3317_vm7, %v3081_v63 }
  0x99   : > { %1072 = vmatmul.f32.vlgmr.msra.gmra.mxu2 %v3386_v16 }
  0x9d   : > { %2858 = vmatmul.msk.f32.vlgmr.msra.gmra.mxu1 %vm3230_vm4, %v3081_v63 }
  0x9f   : > { %2856 = vmatmul.msk.f32.gmra.mxu0 %vm3235_vm5, %v3081_v63  ;;  %2862 = vmatmul.msk.f32.gmra.mxu3 %vm3346_vm8, %v3081_v63 }
  0xa1   : > { %1080 = vmatmul.f32.gmra.mxu2 %v3421_v31 }
  0xa5   : > { %2859 = vmatmul.msk.f32.gmra.mxu1 %vm3235_vm5, %v3081_v63 }
  0xa7   : > { %2857 = vmatmul.msk.f32.gmra.mxu0 %vm3263_vm6, %v3081_v63  ;;  %2863 = vmatmul.msk.f32.gmra.mxu3 %vm3381_vm9, %v3081_v63 }
  0xa9   : > { %1088 = vmatmul.f32.gmra.mxu2 %v3440_v44 }
  0xad   : > { %2860 = vmatmul.msk.f32.gmra.mxu1 %vm3263_vm6, %v3081_v63 }
  0xaf   : > { %1160 = vmatmul.f32.vlgmr.msrb.gmra.mxu0 %v3339_v4  ;;  %2867 = vmatmul.msk.f32.vlgmr.msrb.gmra.mxu3 %vm3317_vm7, %v3081_v63 }
  0xb1   : > { %2864 = vmatmul.msk.f32.vlgmr.msrb.gmra.mxu2 %vm3317_vm7, %v3081_v63 }
  0xb4   : > { %v360_v21 = vpop.f32.mrf.mxu0 }
  0xb5   : > { %1196 = vmatmul.f32.vlgmr.msrb.gmra.mxu1 %v3352_v7 }
  0xb7   : > { %1165 = vmatmul.f32.gmra.mxu0 %v3373_v10  ;;  %2868 = vmatmul.msk.f32.gmra.mxu3 %vm3346_vm8, %v3081_v63 }
  0xb9   : > { %2865 = vmatmul.msk.f32.gmra.mxu2 %vm3346_vm8, %v3081_v63 }
  0xba   : > { %v484_v36 = vpop.f32.mrf.mxu3  ;;  %v412_v45 = vpop.f32.mrf.mxu1 }
  0xbb   : > { %v413_v10 = vadd.f32 %v412_v45, %v360_v21 }
  0xbc   : > { %v368_v42 = vpop.f32.mrf.mxu0  ;;  %v448_v47 = vpop.f32.mrf.mxu2 }
  0xbd   : > { %1202 = vmatmul.f32.gmra.mxu1 %v3389_v17  ;;  %v449_v17 = vadd.f32 %v448_v47, %v413_v10 }
  0xbf   : > { %1170 = vmatmul.f32.gmra.mxu0 %v3413_v22  ;;  %2869 = vmatmul.msk.f32.gmra.mxu3 %vm3381_vm9, %v3081_v63 }
  0xc1   : > { %2866 = vmatmul.msk.f32.gmra.mxu2 %vm3381_vm9, %v3081_v63  ;;  %v485_v63 = vadd.f32 %v484_v36, %v449_v17  ;;  %v333_v36 = vld [vmem:[#allocation2 + $0x8] sm:$0xff] }
  0xc2   : > { %v490_v29 = vpop.f32.mrf.mxu3  ;;  %v416_v58 = vpop.f32.mrf.mxu1 }
  0xc3   : > { %v417_v26 = vadd.f32 %v416_v58, %v368_v42 }
  0xc4   : > { %v376_v53 = vpop.f32.mrf.mxu0  ;;  %v453_v59 = vpop.f32.mrf.mxu2 }
  0xc5   : > { %1208 = vmatmul.f32.gmra.mxu1 %v3424_v32  ;;  %v454_v35 = vadd.f32 %v453_v59, %v417_v26 }
  0xc7   : > { %v491_v40 = vadd.f32 %v490_v29, %v454_v35 }
  0xca   : > { %v496_v60 = vpop.f32.mrf.mxu3  ;;  %v420_v62 = vpop.f32.mrf.mxu1 }
  0xcb   : > { %v421_v41 = vadd.f32 %v420_v62, %v376_v53 }
  0xcc   : > { %v526_v4 = vpop.f32.mrf.mxu0  ;;  %v458_v5 = vpop.f32.mrf.mxu2 }
  0xcd   : > { %v527_v31 = vadd.f32 %v526_v4, %v485_v63  ;;  %v459_v48 = vadd.f32 %v458_v5, %v421_v41  ;;  %v334_v5 = vld [vmem:[#allocation2 + $0x10] sm:$0x7] }
  0xcf   : > { %v497_v56 = vadd.f32 %v496_v60, %v459_v48 }
  0xd2   : > { %v646_v6 = vpop.f32.mrf.mxu3  ;;  %v558_v8 = vpop.f32.mrf.mxu1 }
  0xd3   : > { %v559_v37 = vadd.f32 %v558_v8, %v527_v31 }
  0xd4   : > { %v530_v7 = vpop.f32.mrf.mxu0  ;;  %v594_v16 = vpop.f32.mrf.mxu2 }
  0xd5   : > { %v595_v43 = vadd.f32 %v594_v16, %v559_v37  ;;  %v531_v46 = vadd.f32 %v530_v7, %v491_v40 }
  0xd7   : > { %v647_v49 = vadd.f32 %v646_v6, %v595_v43  ;;  %v1288_v43 = vld [vmem:[#allocation4] sm:$0xff] }
  0xda   : > { %v650_v15 = vpop.f32.mrf.mxu3  ;;  %v562_v13 = vpop.f32.mrf.mxu1 }
  0xdb   : > { %v563_v50 = vadd.f32 %v562_v13, %v531_v46  ;;  %v1293_v46 = vpop.xlane.xlu0 %1292 }
  0xdc   : > { %v534_v22 = vpop.f32.mrf.mxu0  ;;  %v602_v30 = vpop.f32.mrf.mxu2 }
  0xdd   : > { %v603_v57 = vadd.f32 %v602_v30, %v563_v50  ;;  %v535_v9 = vadd.f32 %v534_v22, %v497_v56  ;;  %v1303_v50 = vadd.f32 %v1293_v46, %v1288_v43 }
  0xdf   : > { %v651_v18 = vadd.f32 %v650_v15, %v603_v57  ;;  %1307 = vst.msk [vmem:[#allocation4] sm:$0xff] %vm1306_vm13, %v1303_v50 }
  0xe2   : > { %v654_v32 = vpop.f32.mrf.mxu3  ;;  %v566_v38 = vpop.f32.mrf.mxu1 }
  0xe3   : > { %v567_v19 = vadd.f32 %v566_v38, %v535_v9 }
  0xe4   : > { %v682_v39 = vpop.f32.mrf.mxu0  ;;  %v610_v44 = vpop.f32.mrf.mxu2 }
  0xe5   : > { %v683_v51 = vadd.f32 %v682_v39, %v647_v49  ;;  %v611_v27 = vadd.f32 %v610_v44, %v567_v19 }
  0xe7   : > { %v655_v42 = vadd.f32 %v654_v32, %v611_v27 }
  0xea   : > { %v792_v52 = vpop.f32.mrf.mxu3  ;;  %v718_v55 = vpop.f32.mrf.mxu1 }
  0xeb   : > { %v719_v61 = vadd.f32 %v718_v55, %v683_v51 }
  0xec   : > { %v687_v54 = vpop.f32.mrf.mxu0  ;;  %v760_v0 = vpop.f32.mrf.mxu2 }
  0xed   : > { %v761_v11 = vadd.f32 %v760_v0, %v719_v61  ;;  %v688_v24 = vadd.f32 %v687_v54, %v651_v18  ;;  %v1290_v61 = vld [vmem:[#allocation4 + $0x10] sm:$0x7] }
  0xef   : > { %v793_v23 = vadd.f32 %v792_v52, %v761_v11  ;;  %v1289_v11 = vld [vmem:[#allocation4 + $0x8] sm:$0xff] }
  0xf1   : > { %v803_v28 = vadd.f32 %v793_v23, %v332_v14 }
  0xf2   : > { %v796_v12 = vpop.f32.mrf.mxu3  ;;  %v724_v21 = vpop.f32.mrf.mxu1 }
  0xf3   : > { %807 = vst.msk [vmem:[#allocation2] sm:$0xff] %vm806_vm11, %v803_v28  ;;  %v725_v25 = vadd.f32 %v724_v21, %v688_v24 }
  0xf4   : > { %v692_v20 = vpop.f32.mrf.mxu0  ;;  %v764_v34 = vpop.f32.mrf.mxu2 }
  0xf5   : > { %v765_v33 = vadd.f32 %v764_v34, %v725_v25  ;;  %v693_v47 = vadd.f32 %v692_v20, %v655_v42  ;;  %v1296_v20 = vpop.xlane.xlu0 %1295 }
  0xf6   : > { %v1304_v21 = vadd.f32 %v1296_v20, %v1289_v11 }
  0xf7   : > { %v797_v45 = vadd.f32 %v796_v12, %v765_v33 }
  0xf8   : > { %v1302_v9 = vpop.xlane.xlu1 %1301  ;;  %1308 = vst.msk [vmem:[#allocation4 + $0x8] sm:$0xff] %vm1306_vm13, %v1304_v21 }
  0xf9   : > { %v804_v29 = vadd.f32 %v797_v45, %v333_v36  ;;  %v1305_v19 = vadd.f32 %v1302_v9, %v1290_v61 }
  0xfa   : > { %v800_v53 = vpop.f32.mrf.mxu3  ;;  %v730_v58 = vpop.f32.mrf.mxu1 }
  0xfb   : > { %808 = vst.msk [vmem:[#allocation2 + $0x8] sm:$0xff] %vm806_vm11, %v804_v29  ;;  %v731_v60 = vadd.f32 %v730_v58, %v693_v47 }
  0xfc   : > { %v839_v59 = vpop.f32.mrf.mxu0  ;;  %v768_v62 = vpop.f32.mrf.mxu2  ;;  %1310 = vst.msk [vmem:[#allocation4 + $0x10] sm:$0x7] %vm1309_vm14, %v1305_v19 }
  0xfd   : > { %v769_v4 = vadd.f32 %v768_v62, %v731_v60 }
  0xff   : > { %v801_v6 = vadd.f32 %v800_v53, %v769_v4  ;;  %v811_v4 = vld [vmem:[#allocation3] sm:$0xff] }
 0x101   : > { %v805_v7 = vadd.f32 %v801_v6, %v334_v5 }
 0x102   : > { %v963_v8 = vpop.f32.mrf.mxu3  ;;  %v891_v16 = vpop.f32.mrf.mxu1 }
 0x103   : > { %810 = vst.msk [vmem:[#allocation2 + $0x10] sm:$0x7] %vm809_vm12, %v805_v7  ;;  %v892_v39 = vadd.f32 %v891_v16, %v839_v59 }
 0x104   : > { %v847_v10 = vpop.f32.mrf.mxu0  ;;  %v927_v17 = vpop.f32.mrf.mxu2 }
 0x105   : > { %v928_v41 = vadd.f32 %v927_v17, %v892_v39 }
 0x107   : > { %v964_v51 = vadd.f32 %v963_v8, %v928_v41 }
 0x10a   : > { %v969_v15 = vpop.f32.mrf.mxu3  ;;  %v895_v13 = vpop.f32.mrf.mxu1 }
 0x10b   : > { %v896_v52 = vadd.f32 %v895_v13, %v847_v10 }
 0x10c   : > { %v855_v22 = vpop.f32.mrf.mxu0  ;;  %v932_v63 = vpop.f32.mrf.mxu2 }
 0x10d   : > { %v933_v56 = vadd.f32 %v932_v63, %v896_v52 }
 0x10f   : > { %v970_v23 = vadd.f32 %v969_v15, %v933_v56 }
 0x112   : > { %v975_v26 = vpop.f32.mrf.mxu3  ;;  %v899_v30 = vpop.f32.mrf.mxu1 }
 0x113   : > { %v900_v24 = vadd.f32 %v899_v30, %v855_v22  ;;  %v812_v30 = vld [vmem:[#allocation3 + $0x8] sm:$0xff] }
 0x114   : > { %v1005_v31 = vpop.f32.mrf.mxu0  ;;  %v937_v35 = vpop.f32.mrf.mxu2 }
 0x115   : > { %v1006_v55 = vadd.f32 %v1005_v31, %v964_v51  ;;  %v938_v25 = vadd.f32 %v937_v35, %v900_v24 }
 0x117   : > { %v976_v47 = vadd.f32 %v975_v26, %v938_v25 }
 0x11a   : > { %v1125_v37 = vpop.f32.mrf.mxu3  ;;  %v1037_v38 = vpop.f32.mrf.mxu1 }
 0x11b   : > { %v1038_v57 = vadd.f32 %v1037_v38, %v1006_v55 }
 0x11c   : > { %v1009_v32 = vpop.f32.mrf.mxu0  ;;  %v1073_v40 = vpop.f32.mrf.mxu2 }
 0x11d   : > { %v1074_v28 = vadd.f32 %v1073_v40, %v1038_v57  ;;  %v1010_v27 = vadd.f32 %v1009_v32, %v970_v23 }
 0x11f   : > { %v1126_v34 = vadd.f32 %v1125_v37, %v1074_v28 }
 0x122   : > { %v1129_v44 = vpop.f32.mrf.mxu3  ;;  %v1041_v49 = vpop.f32.mrf.mxu1 }
 0x123   : > { %v1042_v33 = vadd.f32 %v1041_v49, %v1010_v27 }
 0x124   : > { %v1013_v48 = vpop.f32.mrf.mxu0  ;;  %v1081_v54 = vpop.f32.mrf.mxu2 }
 0x125   : > { %v1082_v29 = vadd.f32 %v1081_v54, %v1042_v33  ;;  %v1014_v60 = vadd.f32 %v1013_v48, %v976_v47 }
 0x127   : > { %v1130_v5 = vadd.f32 %v1129_v44, %v1082_v29  ;;  %v813_v44 = vld [vmem:[#allocation3 + $0x10] sm:$0x7] }
 0x12a   : > { %v1133_v0 = vpop.f32.mrf.mxu3  ;;  %v1045_v14 = vpop.f32.mrf.mxu1 }
 0x12b   : > { %v1046_v6 = vadd.f32 %v1045_v14, %v1014_v60 }
 0x12c   : > { %v1161_v18 = vpop.f32.mrf.mxu0  ;;  %v1089_v12 = vpop.f32.mrf.mxu2 }
 0x12d   : > { %v1162_v36 = vadd.f32 %v1161_v18, %v1126_v34  ;;  %v1090_v15 = vadd.f32 %v1089_v12, %v1046_v6 }
 0x12f   : > { %v1134_v31 = vadd.f32 %v1133_v0, %v1090_v15 }
 0x132   : > { %v1271_v42 = vpop.f32.mrf.mxu3  ;;  %v1197_v45 = vpop.f32.mrf.mxu1 }
 0x133   : > { %v1198_v53 = vadd.f32 %v1197_v45, %v1162_v36 }
 0x134   : > { %v1239_v58 = vpop.f32.mrf.mxu2  ;;  %v1166_v59 = vpop.f32.mrf.mxu0 }
 0x135   : > { %v1240_v62 = vadd.f32 %v1239_v58, %v1198_v53  ;;  %v1167_v8 = vadd.f32 %v1166_v59, %v1130_v5 }
 0x137   : > { %v1272_v7 = vadd.f32 %v1271_v42, %v1240_v62 }
 0x139   : > { %v1282_v10 = vadd.f32 %v1272_v7, %v811_v4 }
 0x13a   : > { %v1203_v16 = vpop.f32.mrf.mxu1  ;;  %v1275_v17 = vpop.f32.mrf.mxu3 }
 0x13b   : > { %1285 = vst.msk [vmem:[#allocation3] sm:$0xff] %vm806_vm11, %v1282_v10  ;;  %v1204_v22 = vadd.f32 %v1203_v16, %v1167_v8 }
 0x13c   : > { %v1243_v13 = vpop.f32.mrf.mxu2  ;;  %v1171_v26 = vpop.f32.mrf.mxu0 }
 0x13d   : > { %v1244_v63 = vadd.f32 %v1243_v13, %v1204_v22  ;;  %v1172_v37 = vadd.f32 %v1171_v26, %v1134_v31 }
 0x13f   : > { %v1276_v35 = vadd.f32 %v1275_v17, %v1244_v63 }
 0x141   : > { %v1283_v32 = vadd.f32 %v1276_v35, %v812_v30 }
 0x142   : > { %v1209_v38 = vpop.f32.mrf.mxu1  ;;  %v1279_v41 = vpop.f32.mrf.mxu3 }
 0x143   : > { %1286 = vst.msk [vmem:[#allocation3 + $0x8] sm:$0xff] %vm806_vm11, %v1283_v32  ;;  %v1210_v39 = vadd.f32 %v1209_v38, %v1172_v37 }
 0x144   : > { %v1247_v40 = vpop.f32.mrf.mxu2 }
 0x145   : > { %v1248_v43 = vadd.f32 %v1247_v40, %v1210_v39 }
 0x147   : > { %v1280_v46 = vadd.f32 %v1279_v41, %v1248_v43 }
 0x149   : > { %v1284_v48 = vadd.f32 %v1280_v46, %v813_v44 }
 0x14b   : > { %1287 = vst.msk [vmem:[#allocation3 + $0x10] sm:$0x7] %vm809_vm12, %v1284_v48 }
 0x14c PF: > { %p2870_p1 = scmp.ne.s32.totalorder %s3061_s15, 1 }
 0x14e   : > { %1314 = sbr.rel (%p2870_p1) target bundleno = 966 (0x3c6), region = 44 }
 0x153   : > { %v1317_v49 = vld [vmem:[#allocation4 + $0x10] sm:$0x7]  ;;  %v1315_v50 = vld [vmem:[#allocation4] sm:$0xff]  ;;  %v3082_v51 = vmov 0   ;;  %v1316_v55 = vld [vmem:[#allocation4 + $0x8] sm:$0xff]  ;;  %vm1458_vm15 = vcmask 1042432  }
 0x154   : > { %2960 = vset.pattern.permute.xlu1 %v3082_v51  ;;  %2959 = vset.pattern.permute.xlu0 %v3082_v51  ;;  %v1320_v52 = vadd.f32 1e-06, %v1317_v49  ;;  %v1318_v54 = vadd.f32 1e-06, %v1315_v50  ;;  %v1319_v56 = vadd.f32 1e-06, %v1316_v55 }
 0x155   : > { %v1420_v57 = vld [vmem:[%s3193_s11 + $0x20] sm:$0x7]  ;;  %v1418_v9 = vld [vmem:[%s3193_s11 + $0x10] sm:$0xff]  ;;  %v1421_v59 = vld [vmem:[%s3193_s11 + $0x28] sm:$0x7]  ;;  %vm1393_vm8 = vcmask 154624  }
 0x156   : > { %1336 = vperm.xlu1 %2960, %v1320_v52   ;;  %1326 = vperm.xlu0 %2959, %v1318_v54   ;;  %v1460_v61 = vsel %vm1458_vm15, %v1420_v57, 0  ;;  %v1480_v14 = vand.u32 4294901760, %v1418_v9  ;;  %v1416_v18 = vld [vmem:[%s3193_s11] sm:$0xff]  ;;  %v2516_v42 = vmul.f32 %v1420_v57, %v1420_v57  ;;  %v2514_v45 = vmul.f32 %v1418_v9, %v1418_v9  ;;  %v1419_v8 = vld [vmem:[%s3193_s11 + $0x18] sm:$0xff]  ;;  %v1417_v35 = vld [vmem:[%s3193_s11 + $0x8] sm:$0xff] }
 0x157   : > { %v1478_v0 = vand.u32 4294901760, %v1460_v61  ;;  %v1482_v24 = vand.u32 4294901760, %v1416_v18  ;;  %v2512_v47 = vmul.f32 %v1416_v18, %v1416_v18  ;;  %v1463_v60 = vsel %vm1458_vm15, %v1421_v59, 0 }
 0x158   : > { %v1529_v23 = vsub.f32 %v1418_v9, %v1480_v14  ;;  %v2519_v29 = vsel %vm1458_vm15, %v2516_v42, 0.0  ;;  %v3580_v62 = vand.u32 4294901760, %v1463_v60  ;;  %v3591_v16 = vand.u32 4294901760, %v1419_v8  ;;  %v1323_v42 = vld [vmem:[#allocation2 + $0x10] sm:$0x7] }
 0x159   : > { %v1523_v11 = vsub.f32 %v1460_v61, %v1478_v0  ;;  %1605 = vmatpush.msra.mxu3 %v1478_v0  ;;  %1479 = vmatpush.msra.mxu0 %v1478_v0  ;;  %v1535_v20 = vsub.f32 %v1416_v18, %v1482_v24  ;;  %v2518_v53 = vadd.f32 %v2514_v45, %v2512_v47  ;;  %v3602_v43 = vand.u32 4294901760, %v1417_v35 }
 0x15a   : > { %v1530_v12 = vand.u32 4294901760, %v1529_v23  ;;  %v3584_v6 = vsub.f32 %v1463_v60, %v3580_v62  ;;  %v3597_v26 = vsub.f32 %v1419_v8, %v3591_v16  ;;  %v2517_v31 = vmul.f32 %v1421_v59, %v1421_v59 }
 0x15b   : > { %v1524_v19 = vand.u32 4294901760, %v1523_v11  ;;  %1568 = vmatpush.msra.mxu2 %v1523_v11  ;;  %1607 = vmatpush.msra.mxu3 %v1480_v14  ;;  %v1536_v25 = vand.u32 4294901760, %v1535_v20  ;;  %v3576_v58 = vadd.f32 %v2519_v29, %v2518_v53  ;;  %v2515_v41 = vmul.f32 %v1419_v8, %v1419_v8 }
 0x15c   : > { %1481 = vmatpush.msra.mxu0 %v1480_v14  ;;  %v1531_v27 = vsub.f32 %v1529_v23, %v1530_v12  ;;  %v1758_v7 = vand.u32 4294901760, %v3584_v6  ;;  %v1764_v39 = vand.u32 4294901760, %v3597_v26  ;;  %v2513_v51 = vmul.f32 %v1417_v35, %v1417_v35 }
 0x15d   : > { %v1525_v28 = vsub.f32 %v1523_v11, %v1524_v19  ;;  %1571 = vmatpush.msra.mxu2 %v1529_v23  ;;  %1609 = vmatpush.msra.mxu3 %v1482_v24  ;;  %v1537_v33 = vsub.f32 %v1535_v20, %v1536_v25  ;;  %v3609_v52 = vsub.f32 %v1417_v35, %v3602_v43  ;;  %vm1400_vm13 = vcmask 149504  }
 0x15e   : > { %1331 = vperm.xlu0 %2959, %v1319_v56   ;;  %1483 = vmatpush.msra.mxu0 %v1482_v24  ;;  %v1532_v34 = vand.u32 4294901760, %v1531_v27  ;;  %v1759_v10 = vsub.f32 %v3584_v6, %v1758_v7  ;;  %v1765_v49 = vsub.f32 %v3597_v26, %v1764_v39  ;;  %v2528_v56 = vsel %vm1458_vm15, %v2517_v31, 0.0 }
 0x15f   : > { %v1526_v21 = vand.u32 4294901760, %v1525_v28  ;;  %1574 = vmatpush.msra.mxu2 %v1535_v20  ;;  %v1538_v36 = vand.u32 4294901760, %v1537_v33  ;;  %v2527_v11 = vadd.f32 %v2515_v41, %v2513_v51 }
 0x160   : > { %1645 = vmatpush.msrb.mxu0 %v1524_v19  ;;  %v1760_v15 = vand.u32 4294901760, %v1759_v10  ;;  %v1766_v57 = vand.u32 4294901760, %v1765_v49  ;;  %v1321_v19 = vld [vmem:[#allocation2] sm:$0xff] }
 0x161   : > { %1527 = vmatpush.msra.mxu1 %v1526_v21  ;;  %1713 = vmatpush.msrb.mxu2 %v3580_v62  ;;  %v3626_v20 = vadd.f32 %v2528_v56, %v2527_v11 }
 0x162   : > { %1649 = vmatpush.msrb.mxu0 %v1530_v12  ;;  %1761 = vmatpush.msrb.mxu3 %v1760_v15  ;;  %v1385_v15 = vld [vmem:[#allocation3 + $0x8] sm:$0xff] }
 0x163   : > { %1533 = vmatpush.msra.mxu1 %v1532_v34  ;;  %1715 = vmatpush.msrb.mxu2 %v3591_v16 }
 0x164   : > { %1653 = vmatpush.msrb.mxu0 %v1536_v25  ;;  %1767 = vmatpush.msrb.mxu3 %v1766_v57 }
 0x165   : > { %1539 = vmatpush.msra.mxu1 %v1538_v36  ;;  %1717 = vmatpush.msrb.mxu2 %v3602_v43 }
 0x167   : > { %1681 = vmatpush.msrb.mxu1 %v1478_v0  ;;  %v1426_v0 = vld [vmem:[%s3198_s26 + $0x20] sm:$0x7] }
 0x169   : > { %1683 = vmatpush.msrb.mxu1 %v1480_v14  ;;  %v1770_v14 = vand.u32 4294901760, %v3609_v52 }
 0x16b   : > { %1685 = vmatpush.msrb.mxu1 %v1482_v24  ;;  %v1771_v21 = vsub.f32 %v3609_v52, %v1770_v14 }
 0x16d   : > { %v1772_v36 = vand.u32 4294901760, %v1771_v21  ;;  %v1424_v21 = vld [vmem:[%s3198_s26 + $0x10] sm:$0xff] }
 0x16f   : > { %1773 = vmatpush.msrb.mxu3 %v1772_v36  ;;  %v1422_v36 = vld [vmem:[%s3198_s26] sm:$0xff] }
 0x1c8   : > { %v1337_v4 = vpop.permute.xlu1 %1336  ;;  %v1327_v5 = vpop.permute.xlu0 %1326 }
 0x1c9   : > { %2961 = vrcp.f32 %v1337_v4  ;;  %vm1374_vm0 = vweird.f32 %v1337_v4  ;;  %v1378_v32 = vand.u32 2147483647, %v1337_v4  ;;  %v1380_v38 = vand.u32 2147483648, %v1337_v4 }
 0x1ca   : > { %2963 = vrcp.f32 %v1327_v5  ;;  %v1348_v46 = vand.u32 2147483647, %v1327_v5  ;;  %v1350_v48 = vand.u32 2147483648, %v1327_v5  ;;  %vm1344_vm4 = vweird.f32 %v1327_v5 }
 0x1cb   : > { %vm3617_vm5 = vcmp.eq.f32.partialorder %v1378_v32, 8.507059e+37  ;;  %v1381_v18 = vor.u32 1.1754944e-38, %v1380_v38 }
 0x1cc   : > { %vm1349_vm7 = vcmp.eq.f32.partialorder %v1348_v46, 8.507059e+37  ;;  %v1351_v23 = vor.u32 1.1754944e-38, %v1350_v48  ;;  %v1384_v48 = vld [vmem:[#allocation3] sm:$0xff] }
 0x1cf   : > { %v2962_v17 = vpop.eup %2961 }
 0x1d0   : > { %v2964_v22 = vpop.eup %2963  ;;  %v1370_v13 = vmul.f32 %v2962_v17, %v1337_v4  ;;  %v3594_v63 = vpop.permute.xlu0 %1331  ;;  %vm1375_vm1 = vweird.f32 %v2962_v17 }
 0x1d1   : > { %v1340_v30 = vmul.f32 %v2964_v22, %v1327_v5  ;;  %2965 = vrcp.f32 %v3594_v63  ;;  %vm1345_vm2 = vweird.f32 %v2964_v22  ;;  %vm3612_vm3 = vmor %vm1374_vm0, %vm1375_vm1  ;;  %v1365_v33 = vand.u32 2147483648, %v3594_v63 }
 0x1d2   : > { %v1371_v37 = vsub.f32 1.0, %v1370_v13  ;;  %vm1346_vm6 = vmor %vm1344_vm4, %vm1345_vm2  ;;  %v1363_v29 = vand.u32 2147483647, %v3594_v63  ;;  %vm1359_vm10 = vweird.f32 %v3594_v63 }
 0x1d3   : > { %v1341_v40 = vsub.f32 1.0, %v1340_v30  ;;  %v1366_v8 = vor.u32 1.1754944e-38, %v1365_v33 }
 0x1d4   : > { %v1372_v44 = vmul.f32 %v2962_v17, %v1371_v37  ;;  %vm1364_vm12 = vcmp.eq.f32.partialorder %v1363_v29, 8.507059e+37 }
 0x1d5   : > { %v1342_v50 = vmul.f32 %v2964_v22, %v1341_v40 }
 0x1d6   : > { %v1373_v54 = vadd.f32 %v2962_v17, %v1372_v44 }
 0x1d7   : > { %v2966_v61 = vpop.eup %2965  ;;  %v1343_v9 = vadd.f32 %v2964_v22, %v1342_v50 }
 0x1d8   : > { %v1355_v24 = vmul.f32 %v2966_v61, %v3594_v63  ;;  %v1377_v28 = vsel %vm3612_vm3, %v2962_v17, %v1373_v54  ;;  %vm1360_vm9 = vweird.f32 %v2966_v61  ;;  %v1322_v17 = vld [vmem:[#allocation2 + $0x8] sm:$0xff] }
 0x1d9   : > { %v1347_v12 = vsel %vm1346_vm6, %v2964_v22, %v1343_v9  ;;  %v3634_v45 = vsel %vm3617_vm5, %v1381_v18, %v1377_v28  ;;  %vm1361_vm11 = vmor %vm1359_vm10, %vm1360_vm9 }
 0x1da   : > { %v1352_v27 = vsel %vm1349_vm7, %v1351_v23, %v1347_v12  ;;  %v1356_v25 = vsub.f32 1.0, %v1355_v24  ;;  %v1383_v5 = vmul.f32 %v3634_v45, %v1323_v42  ;;  %v2540_v42 = vmul.f32 %v1426_v0, %v1426_v0 }
 0x1db   : > { %v1353_v34 = vmul.f32 %v1352_v27, %v1321_v19 }
 0x1dc   : > { %v1357_v47 = vmul.f32 %v2966_v61, %v1356_v25  ;;  %v1456_v37 = vsel %vm1393_vm8, %v1383_v5, 0 }
 0x1dd   : > { %v1450_v53 = vsel %vm1393_vm8, %v1353_v34, 0  ;;  %v1390_v59 = vmul.f32 %v1353_v34, %v1353_v34 }
 0x1de   : > { %v3638_v60 = vand.u32 4294901760, %v1450_v53  ;;  %v1358_v4 = vadd.f32 %v2966_v61, %v1357_v47  ;;  %v2538_v47 = vmul.f32 %v1424_v21, %v1424_v21 }
 0x1df   : > { %v1394_v10 = vsel %vm1393_vm8, %v1390_v59, 0.0 }
 0x1e0   : > { %1541 = vmatmul.f32.vlgmr.msra.gmra.mxu1 %v3638_v60  ;;  %1395 = vadd.xlane.f32.xlu1 %v1394_v10  ;;  %v3645_v22 = vsub.f32 %v1450_v53, %v3638_v60  ;;  %v1362_v13 = vsel %vm1361_vm11, %v2966_v61, %v1358_v4  ;;  %v1392_v61 = vmul.f32 %v1383_v5, %v1383_v5  ;;  %v2543_v5 = vsel %vm1458_vm15, %v2540_v42, 0.0 }
 0x1e1   : > { %v1367_v30 = vsel %vm1364_vm12, %v1366_v8, %v1362_v13  ;;  %1839 = vmatpush.msra.mxu1 %v3580_v62  ;;  %v2536_v4 = vmul.f32 %v1422_v36, %v1422_v36 }
 0x1e2   : > { %1577 = vmatmul.f32.vlgmr.msra.gmra.mxu2 %v3645_v22  ;;  %v3650_v63 = vand.u32 4294901760, %v3645_v22  ;;  %v1388_v31 = vmul.f32 %v1385_v15, %v1367_v30  ;;  %v1368_v35 = vmul.f32 %v1367_v30, %v1322_v17  ;;  %v1401_v18 = vsel %vm1400_vm13, %v1392_v61, 0.0 }
 0x1e3   : > { %1879 = vmatpush.msra.mxu2 %v1758_v7  ;;  %1841 = vmatpush.msra.mxu1 %v3591_v16  ;;  %v3668_v7 = vand.u32 4294901760, %v1456_v37  ;;  %v2542_v17 = vadd.f32 %v2538_v47, %v2536_v4  ;;  %v2521_v47 = vrot.slane %v3576_v58, 4 }
 0x1e4   : > { %1613 = vmatmul.f32.vlgmr.msra.gmra.mxu3 %v3650_v63  ;;  %v1487_v32 = vsub.f32 %v3645_v22, %v3650_v63  ;;  %v1405_v38 = vmul.f32 %v1388_v31, %v1388_v31  ;;  %v3660_v40 = vsel %vm1393_vm8, %v1388_v31, 0  ;;  %v1453_v41 = vsel %vm1393_vm8, %v1368_v35, 0  ;;  %v1427_v31 = vld [vmem:[%s3198_s26 + $0x28] sm:$0x7] }
 0x1e5   : > { %v3663_v44 = vand.u32 4294901760, %v1453_v41  ;;  %v1391_v46 = vmul.f32 %v1368_v35, %v1368_v35  ;;  %1915 = vmatpush.msra.mxu3 %v3580_v62  ;;  %1883 = vmatpush.msra.mxu2 %v1764_v39  ;;  %v3678_v62 = vmul.f32 %v1384_v48, %v1352_v27  ;;  %v3686_v55 = vsub.f32 %v1456_v37, %v3668_v7 }
 0x1e6   : > { %v1488_v49 = vand.u32 4294901760, %v1487_v32  ;;  %v1410_v50 = vsel %vm1393_vm8, %v1405_v38, 0.0  ;;  %1843 = vmatpush.msra.mxu1 %v3602_v43  ;;  %v1963_v27 = vand.u32 4294901760, %v1424_v21  ;;  %v3738_v13 = vadd.f32 %v2543_v5, %v2542_v17 }
 0x1e7   : > { %1411 = vadd.xlane.f32.xlu0 %v1410_v50  ;;  %v1397_v51 = vsel %vm1393_vm8, %v1391_v46, 0.0  ;;  %v3674_v54 = vsub.f32 %v1453_v41, %v3663_v44  ;;  %1917 = vmatpush.msra.mxu3 %v3591_v16  ;;  %v3699_v57 = vand.u32 4294901760, %v3686_v55  ;;  %v1946_v35 = vsel %vm1458_vm15, %v1427_v31, 0  ;;  %v1425_v46 = vld [vmem:[%s3198_s26 + $0x18] sm:$0xff] }
 0x1e8   : > { %1489 = vmatmul.f32.vlgmr.msra.gmra.mxu0 %v1488_v49  ;;  %1545 = vmatmul.f32.gmra.mxu1 %v3663_v44  ;;  %v3725_v34 = vsub.f32 %v1424_v21, %v1963_v27  ;;  %v2195_v37 = vand.u32 4294901760, %v1946_v35  ;;  %v2197_v48 = vand.u32 4294901760, %v1425_v46 }
 0x1e9   : > { %1398 = vadd.xlane.f32.xlu2 %v1397_v51  ;;  %v3681_v39 = vand.u32 4294901760, %v3674_v54  ;;  %1802 = vmatpush.msra.mxu0 %v3584_v6  ;;  %v1404_v6 = vmul.f32 %v3678_v62, %v3678_v62  ;;  %v1934_v51 = vsel %vm1393_vm8, %v3678_v62, 0 }
 0x1ea   : > { %1582 = vmatmul.f32.gmra.mxu2 %v3674_v54  ;;  %1919 = vmatpush.msra.mxu3 %v3602_v43  ;;  %v2013_v29 = vand.u32 4294901760, %v3725_v34  ;;  %v3745_v32 = vsub.f32 %v1946_v35, %v2195_v37 }
 0x1eb   : > { %v1495_v16 = vsub.f32 %v3674_v54, %v3681_v39  ;;  %1805 = vmatpush.msra.mxu0 %v3597_v26  ;;  %1887 = vmatpush.msra.mxu2 %v1770_v14  ;;  %v1407_v43 = vsel %vm1393_vm8, %v1404_v6, 0.0  ;;  %v1503_v26 = vsub.f32 %v3686_v55, %v3699_v57  ;;  %v1386_v14 = vld [vmem:[#allocation3 + $0x10] sm:$0x7] }
 0x1ec   : > { %1619 = vmatmul.f32.gmra.mxu3 %v3681_v39  ;;  %v3714_v23 = vmul.f32 %v1386_v14, %v3634_v45  ;;  %v1965_v45 = vand.u32 4294901760, %v1422_v36  ;;  %v2014_v59 = vsub.f32 %v3725_v34, %v2013_v29  ;;  %v2241_v38 = vand.u32 4294901760, %v3745_v32 }
 0x1ed   : > { %v1496_v56 = vand.u32 4294901760, %v1495_v16  ;;  %1808 = vmatpush.msra.mxu0 %v3609_v52  ;;  %v1943_v52 = vsel %vm1458_vm15, %v1426_v0, 0  ;;  %v1504_v9 = vand.u32 4294901760, %v1503_v26  ;;  %v2539_v16 = vmul.f32 %v1425_v46, %v1425_v46 }
 0x1ee   : > { %v1961_v11 = vand.u32 4294901760, %v1943_v52  ;;  %v1406_v28 = vmul.f32 %v3714_v23, %v3714_v23  ;;  %v2018_v53 = vsub.f32 %v1422_v36, %v1965_v45  ;;  %v2015_v10 = vand.u32 4294901760, %v2014_v59  ;;  %v1428_v36 = vld [vmem:[%s3188_s8] sm:$0x3] }
 0x1ef   : > { %v2242_v41 = vsub.f32 %v3745_v32, %v2241_v38  ;;  %v3772_v14 = vand.u32 4294901760, %v3660_v40  ;;  %v1429_v42 = vperm.slane %v1428_v36, 0 }
 0x1f0   : > { %1497 = vmatmul.f32.gmra.mxu0 %v1496_v56  ;;  %1549 = vmatmul.f32.gmra.mxu1 %v3668_v7  ;;  %v3711_v19 = vsub.f32 %v1943_v52, %v1961_v11  ;;  %v1413_v33 = vsel %vm1400_vm13, %v1406_v28, 0.0  ;;  %v2019_v8 = vand.u32 4294901760, %v2018_v53 }
 0x1f1   : > { %1408 = vadd.xlane.f32.xlu2 %v1407_v43  ;;  %v3761_v43 = vand.u32 4294901760, %v1934_v51  ;;  %vm1433_vm14 = vcmp.eq.s32.totalorder %v1429_v42, %v3180_v2  ;;  %vm1431_vm1 = vcmp.eq.s32.totalorder %v1429_v42, %v3177_v1  ;;  %vm1435_vm3 = vcmp.eq.s32.totalorder %v1429_v42, %v3183_v3 }
 0x1f2   : > { %1587 = vmatmul.f32.gmra.mxu2 %v3686_v55  ;;  %v2007_v24 = vand.u32 4294901760, %v3711_v19  ;;  %v2020_v15 = vsub.f32 %v2018_v53, %v2019_v8 }
 0x1f4   : > { %1625 = vmatmul.f32.gmra.mxu3 %v3699_v57  ;;  %v2008_v12 = vsub.f32 %v3711_v19, %v2007_v24  ;;  %v2021_v30 = vand.u32 4294901760, %v2020_v15 }
 0x1f6   : > { %v2009_v25 = vand.u32 4294901760, %v2008_v12 }
 0x1f8   : > { %1505 = vmatmul.f32.gmra.mxu0 %v1504_v9  ;;  %1687 = vmatmul.f32.vlgmr.msrb.gmra.mxu1 %v3638_v60 }
 0x1f9   : > { %1402 = vadd.xlane.f32.xlu2 %v1401_v18  ;;  %2010 = vmatpush.msrb.mxu1 %v2009_v25 }
 0x1fa   : > { %1723 = vmatmul.f32.vlgmr.msrb.gmra.mxu2 %v1488_v49  ;;  %v2243_v49 = vand.u32 4294901760, %v2242_v41 }
 0x1fb   : > { %2051 = vmatpush.msrb.mxu2 %v3711_v19  ;;  %2016 = vmatpush.msrb.mxu1 %v2015_v10  ;;  %v3083_v10 = vmov 0.0  }
 0x1fc   : > { %1775 = vmatmul.f32.vlgmr.msrb.gmra.mxu3 %v3638_v60  ;;  %v3819_v17 = vsel %vm1433_vm14, 1.0, %v3083_v10  ;;  %v3827_v35 = vsel %vm1431_vm1, 1.0, %v3083_v10 }
 0x1fd   : > { %2088 = vmatpush.msrb.mxu3 %v1961_v11  ;;  %2054 = vmatpush.msrb.mxu2 %v3725_v34 }
 0x1fe   : > { %2022 = vmatpush.msrb.mxu1 %v2021_v30  ;;  %v2522_v30 = vadd.f32 %v2521_v47, %v3576_v58 }
 0x1ff   : > { %2090 = vmatpush.msrb.mxu3 %v1963_v27  ;;  %2057 = vmatpush.msrb.mxu2 %v2018_v53  ;;  %v2530_v53 = vrot.slane %v3626_v20, 4 }
 0x200   : > { %1655 = vmatmul.f32.vlgmr.msrb.gmra.mxu0 %v3638_v60  ;;  %1691 = vmatmul.f32.gmra.mxu1 %v3663_v44 }
 0x201   : > { %1414 = vadd.xlane.f32.xlu2 %v1413_v33  ;;  %1962 = vmatpush.msrb.mxu0 %v1961_v11 }
 0x202   : > { %1731 = vmatmul.f32.gmra.mxu2 %v1496_v56  ;;  %2092 = vmatpush.msrb.mxu3 %v1965_v45 }
 0x203   : > { %1964 = vmatpush.msrb.mxu0 %v1963_v27 }
 0x204   : > { %1779 = vmatmul.f32.gmra.mxu3 %v3663_v44 }
 0x205   : > { %1966 = vmatpush.msrb.mxu0 %v1965_v45 }
 0x208   : > { %1659 = vmatmul.f32.gmra.mxu0 %v3663_v44  ;;  %1695 = vmatmul.f32.gmra.mxu1 %v3668_v7 }
 0x20a   : > { %1739 = vmatmul.f32.gmra.mxu2 %v1504_v9 }
 0x20c   : > { %1783 = vmatmul.f32.gmra.mxu3 %v3668_v7 }
 0x210   : > { %1663 = vmatmul.f32.gmra.mxu0 %v3668_v7  ;;  %1847 = vmatmul.f32.vlgmr.msra.gmra.mxu1 %v3650_v63  ;;  %v2246_v63 = vsub.f32 %v1425_v46, %v2197_v48 }
 0x211   : > { %2164 = vmatpush.msra.mxu1 %v1961_v11 }
 0x212   : > { %1889 = vmatmul.f32.vlgmr.msra.gmra.mxu2 %v3638_v60  ;;  %v2247_v50 = vand.u32 4294901760, %v2246_v63 }
 0x213   : > { %2196 = vmatpush.msra.mxu2 %v2195_v37  ;;  %2166 = vmatpush.msra.mxu1 %v1963_v27 }
 0x214   : > { %1921 = vmatmul.f32.vlgmr.msra.gmra.mxu3 %v3638_v60  ;;  %v2541_v60 = vmul.f32 %v1427_v31, %v1427_v31  ;;  %v2248_v6 = vsub.f32 %v2246_v63, %v2247_v50 }
 0x215   : > { %2168 = vmatpush.msra.mxu1 %v1965_v45  ;;  %2198 = vmatpush.msra.mxu2 %v2197_v48  ;;  %v1430_v45 = vperm.slane %v1428_v36, 1 }
 0x216   : > { %2244 = vmatpush.msra.mxu3 %v2243_v49  ;;  %v2552_v26 = vsel %vm1458_vm15, %v2541_v60, 0.0  ;;  %v2249_v61 = vand.u32 4294901760, %v2248_v6 }
 0x217   : > { %vm1434_vm0 = vcmp.eq.s32.totalorder %v1430_v45, %v3180_v2  ;;  %vm1432_vm2 = vcmp.eq.s32.totalorder %v1430_v45, %v3177_v1  ;;  %vm1436_vm4 = vcmp.eq.s32.totalorder %v1430_v45, %v3183_v3  ;;  %v2531_v1 = vadd.f32 %v2530_v53, %v3626_v20 }
 0x218   : > { %1811 = vmatmul.f32.vlgmr.msra.gmra.mxu0 %v3645_v22  ;;  %1853 = vmatmul.f32.gmra.mxu1 %v3681_v39  ;;  %v1423_v22 = vld [vmem:[%s3198_s26 + $0x8] sm:$0xff]  ;;  %v3821_v2 = vsel %vm1434_vm0, 1.0, %v3083_v10  ;;  %v3836_v58 = vsel %vm1436_vm4, 1.0, %v3083_v10 }
 0x219   : > { %2128 = vmatpush.msra.mxu0 %v2007_v24  ;;  %v2199_v56 = vand.u32 4294901760, %v1423_v22  ;;  %v2537_v39 = vmul.f32 %v1423_v22, %v1423_v22  ;;  %2250 = vmatpush.msra.mxu3 %v2249_v61 }
 0x21a   : > { %1893 = vmatmul.f32.gmra.mxu2 %v3663_v44 }
 0x21b   : > { %2132 = vmatpush.msra.mxu0 %v2013_v29  ;;  %2200 = vmatpush.msra.mxu2 %v2199_v56  ;;  %v2551_v0 = vadd.f32 %v2539_v16, %v2537_v39  ;;  %v2252_v62 = vsub.f32 %v1423_v22, %v2199_v56 }
 0x21c   : > { %1925 = vmatmul.f32.gmra.mxu3 %v3663_v44  ;;  %v1968_v44 = vsub.f32 %v1934_v51, %v3761_v43 }
 0x21d   : > { %2136 = vmatpush.msra.mxu0 %v2019_v8  ;;  %v3766_v52 = vadd.f32 %v2552_v26, %v2551_v0  ;;  %v2253_v9 = vand.u32 4294901760, %v2252_v62 }
 0x21e   : > { %v1969_v18 = vand.u32 4294901760, %v1968_v44 }
 0x21f   : > { %v2254_v11 = vsub.f32 %v2252_v62, %v2253_v9 }
 0x220   : > { %1816 = vmatmul.f32.gmra.mxu0 %v3674_v54  ;;  %1859 = vmatmul.f32.gmra.mxu1 %v3699_v57  ;;  %v1970_v54 = vsub.f32 %v1968_v44, %v1969_v18  ;;  %v3778_v57 = vsub.f32 %v3660_v40, %v3772_v14 }
 0x221   : > { %v2255_v19 = vand.u32 4294901760, %v2254_v11 }
 0x222   : > { %1897 = vmatmul.f32.gmra.mxu2 %v3668_v7  ;;  %v1977_v28 = vand.u32 4294901760, %v3778_v57 }
 0x223   : > { %2256 = vmatpush.msra.mxu3 %v2255_v19 }
 0x224   : > { %1929 = vmatmul.f32.gmra.mxu3 %v3668_v7  ;;  %v1940_v7 = vsel %vm1393_vm8, %v3714_v23, 0  ;;  %v1978_v40 = vsub.f32 %v3778_v57, %v1977_v28 }
 0x225   : > { %v3782_v24 = vand.u32 4294901760, %v1940_v7 }
 0x226   : > { %v1979_v12 = vand.u32 4294901760, %v1978_v40 }
 0x227   : > { %v3790_v23 = vsub.f32 %v1940_v7, %v3782_v24 }
 0x228   : > { %1821 = vmatmul.f32.gmra.mxu0 %v3686_v55  ;;  %2024 = vmatmul.f32.vlgmr.msrb.gmra.mxu1 %v3761_v43  ;;  %v1971_v55 = vand.u32 4294901760, %v1970_v54 }
 0x229   : > { %2322 = vmatpush.msrb.mxu1 %v2195_v37  ;;  %v1985_v21 = vand.u32 4294901760, %v3790_v23 }
 0x22a   : > { %2060 = vmatmul.f32.vlgmr.msrb.gmra.mxu2 %v1968_v44 }
 0x22b   : > { %2362 = vmatpush.msrb.mxu2 %v2241_v38  ;;  %2324 = vmatpush.msrb.mxu1 %v2197_v48  ;;  %v1986_v27 = vsub.f32 %v3790_v23, %v1985_v21  ;;  %v3831_v38 = vsel %vm1435_vm3, 1.0, %v3083_v10 }
 0x22c   : > { %2096 = vmatmul.f32.vlgmr.msrb.gmra.mxu3 %v1969_v18 }
 0x22d   : > { %2398 = vmatpush.msrb.mxu3 %v2195_v37  ;;  %2366 = vmatpush.msrb.mxu2 %v2247_v50  ;;  %v1987_v25 = vand.u32 4294901760, %v1986_v27  ;;  %v3829_v37 = vsel %vm1432_vm2, 1.0, %v3083_v10 }
 0x22e   : > { %2326 = vmatpush.msrb.mxu1 %v2199_v56 }
 0x22f   : > { %2400 = vmatpush.msrb.mxu3 %v2197_v48  ;;  %2370 = vmatpush.msrb.mxu2 %v2253_v9 }
 0x230   : > { %1972 = vmatmul.f32.vlgmr.msrb.gmra.mxu0 %v1971_v55  ;;  %2028 = vmatmul.f32.gmra.mxu1 %v3772_v14 }
 0x231   : > { %2285 = vmatpush.msrb.mxu0 %v3745_v32  ;;  %2402 = vmatpush.msrb.mxu3 %v2199_v56  ;;  %v2532_v56 = vrot.slane %v2531_v1, 2 }
 0x232   : > { %2065 = vmatmul.f32.gmra.mxu2 %v3778_v57 }
 0x233   : > { %2288 = vmatpush.msrb.mxu0 %v2246_v63  ;;  %v2523_v63 = vrot.slane %v2522_v30, 2 }
 0x234   : > { %2102 = vmatmul.f32.gmra.mxu3 %v1977_v28 }
 0x235   : > { %2291 = vmatpush.msrb.mxu0 %v2252_v62  ;;  %v2524_v11 = vadd.f32 %v2523_v63, %v2522_v30 }
 0x238   : > { %1980 = vmatmul.f32.gmra.mxu0 %v1979_v12  ;;  %2032 = vmatmul.f32.gmra.mxu1 %v3782_v24 }
 0x23a   : > { %2070 = vmatmul.f32.gmra.mxu2 %v3790_v23 }
 0x23c   : > { %2108 = vmatmul.f32.gmra.mxu3 %v1985_v21 }
 0x240   : > { %1988 = vmatmul.f32.gmra.mxu0 %v1987_v25  ;;  %2170 = vmatmul.f32.vlgmr.msra.gmra.mxu1 %v3761_v43 }
 0x242   : > { %2206 = vmatmul.f32.vlgmr.msra.gmra.mxu2 %v1971_v55 }
 0x244   : > { %2258 = vmatmul.f32.vlgmr.msra.gmra.mxu3 %v3761_v43 }
 0x248   : > { %2138 = vmatmul.f32.vlgmr.msra.gmra.mxu0 %v3761_v43  ;;  %2174 = vmatmul.f32.gmra.mxu1 %v3772_v14 }
 0x24a   : > { %2214 = vmatmul.f32.gmra.mxu2 %v1979_v12 }
 0x24c   : > { %2262 = vmatmul.f32.gmra.mxu3 %v3772_v14 }
 0x250   : > { %2142 = vmatmul.f32.gmra.mxu0 %v3772_v14  ;;  %2178 = vmatmul.f32.gmra.mxu1 %v3782_v24 }
 0x252   : > { %2222 = vmatmul.f32.gmra.mxu2 %v1987_v25 }
 0x253   : > { %v1396_v32 = vpop.xlane.xlu1 %1395 }
 0x254   : > { %2266 = vmatmul.f32.gmra.mxu3 %v3782_v24  ;;  %v2464_v48 = vmul.f32 %v3827_v35, %v1396_v32  ;;  %v2465_v20 = vmul.f32 %v3829_v37, %v1396_v32 }
 0x258   : > { %2146 = vmatmul.f32.gmra.mxu0 %v3782_v24  ;;  %2330 = vmatmul.f32.vlgmr.msrb.gmra.mxu1 %v1969_v18 }
 0x25a   : > { %2372 = vmatmul.f32.vlgmr.msrb.gmra.mxu2 %v3761_v43 }
 0x25c   : > { %v1399_v34 = vpop.xlane.xlu2 %1398  ;;  %2404 = vmatmul.f32.vlgmr.msrb.gmra.mxu3 %v3761_v43 }
 0x25d   : > { %v1542_v33 = vpop.f32.mrf.mxu1  ;;  %v2466_v41 = vmul.f32 %v3819_v17, %v1399_v34  ;;  %v2467_v46 = vmul.f32 %v3821_v2, %v1399_v34 }
 0x25f   : > { %v2470_v6 = vadd.f32 %v2466_v41, %v2464_v48  ;;  %v2479_v22 = vadd.f32 %v2467_v46, %v2465_v20 }
 0x260   : > { %2294 = vmatmul.f32.vlgmr.msrb.gmra.mxu0 %v1968_v44  ;;  %2336 = vmatmul.f32.gmra.mxu1 %v1977_v28 }
 0x262   : > { %2376 = vmatmul.f32.gmra.mxu2 %v3772_v14 }
 0x264   : > { %v3812_v29 = vpop.xlane.xlu2 %1408  ;;  %2408 = vmatmul.f32.gmra.mxu3 %v3772_v14  ;;  %v2533_v14 = vadd.f32 %v2532_v56, %v2531_v1 }
 0x265   : > { %v1490_v59 = vpop.f32.mrf.mxu0  ;;  %v1546_v4 = vpop.f32.mrf.mxu1  ;;  %v2488_v30 = vmul.f32 %v3827_v35, %v3812_v29 }
 0x266   : > { %v1543_v5 = vadd.f32 %v1542_v33, %v1490_v59  ;;  %v1578_v8 = vpop.f32.mrf.mxu2  ;;  %v2534_v40 = vrot.slane %v2533_v14, 1 }
 0x267   : > { %v1614_v15 = vpop.f32.mrf.mxu3 }
 0x268   : > { %v1579_v31 = vadd.f32 %v1578_v8, %v1543_v5  ;;  %2299 = vmatmul.f32.gmra.mxu0 %v3778_v57  ;;  %2342 = vmatmul.f32.gmra.mxu1 %v1985_v21  ;;  %v2535_v47 = vadd.f32 %v2534_v40, %v2533_v14  ;;  %v3848_v5 = vpop.xlane.xlu0 %1411 }
 0x269   : > { %v2490_v48 = vmul.f32 %v3819_v17, %v3848_v5 }
 0x26a   : > { %v1615_v3 = vadd.f32 %v1614_v15, %v1579_v31  ;;  %2380 = vmatmul.f32.gmra.mxu2 %v3782_v24 }
 0x26c   : > { %v1403_v49 = vpop.xlane.xlu2 %1402  ;;  %2412 = vmatmul.f32.gmra.mxu3 %v3782_v24  ;;  %v2525_v24 = vrot.slane %v2524_v11, 1 }
 0x26d   : > { %v2468_v60 = vmul.f32 %v3831_v38, %v1403_v49  ;;  %v2469_v50 = vmul.f32 %v3836_v58, %v1403_v49  ;;  %v1498_v51 = vpop.f32.mrf.mxu0  ;;  %v1550_v16 = vpop.f32.mrf.mxu1 }
 0x26e   : > { %v1547_v39 = vadd.f32 %v1546_v4, %v1498_v51  ;;  %v1583_v43 = vpop.f32.mrf.mxu2  ;;  %v2526_v45 = vadd.f32 %v2525_v24, %v2524_v11 }
 0x26f   : > { %v2471_v26 = vsel %vm1458_vm15, %v2468_v60, 0.0  ;;  %v2480_v61 = vsel %vm1458_vm15, %v2469_v50, 0.0  ;;  %v1620_v0 = vpop.f32.mrf.mxu3  ;;  %v2494_v50 = vadd.f32 %v2490_v48, %v2488_v30 }
 0x270   : > { %v2472_v62 = vadd.f32 %v2471_v26, %v2470_v6  ;;  %v2481_v44 = vadd.f32 %v2480_v61, %v2479_v22  ;;  %v1584_v9 = vadd.f32 %v1583_v43, %v1547_v39  ;;  %2304 = vmatmul.f32.gmra.mxu0 %v3790_v23  ;;  %v2545_v6 = vrot.slane %v3738_v13, 4 }
 0x272   : > { %v2473_v18 = vrot.slane %v2472_v62, 4  ;;  %v2482_v19 = vrot.slane %v2481_v44, 4  ;;  %v1621_v54 = vadd.f32 %v1620_v0, %v1584_v9  ;;  %v2546_v14 = vadd.f32 %v2545_v6, %v3738_v13 }
 0x274   : > { %v2474_v57 = vadd.f32 %v2473_v18, %v2472_v62  ;;  %v2483_v7 = vadd.f32 %v2482_v19, %v2481_v44  ;;  %v3846_v42 = vpop.xlane.xlu2 %1414  ;;  %v2547_v40 = vrot.slane %v2546_v14, 2 }
 0x275   : > { %v1506_v55 = vpop.f32.mrf.mxu0  ;;  %v1688_v28 = vpop.f32.mrf.mxu1  ;;  %v2492_v15 = vmul.f32 %v3831_v38, %v3846_v42 }
 0x276   : > { %v2475_v12 = vrot.slane %v2474_v57, 2  ;;  %v2484_v21 = vrot.slane %v2483_v7, 2  ;;  %v1551_v27 = vadd.f32 %v1550_v16, %v1506_v55  ;;  %v1588_v25 = vpop.f32.mrf.mxu2 }
 0x277   : > { %v1626_v34 = vpop.f32.mrf.mxu3  ;;  %v2495_v63 = vsel %vm1458_vm15, %v2492_v15, 0.0 }
 0x278   : > { %v2476_v33 = vadd.f32 %v2475_v12, %v2474_v57  ;;  %v2485_v36 = vadd.f32 %v2484_v21, %v2483_v7  ;;  %v1589_v23 = vadd.f32 %v1588_v25, %v1551_v27  ;;  %v2496_v16 = vadd.f32 %v2495_v63, %v2494_v50 }
 0x27a   : > { %v2477_v53 = vrot.slane %v2476_v33, 1  ;;  %v2486_v59 = vrot.slane %v2485_v36, 1  ;;  %v1627_v4 = vadd.f32 %v1626_v34, %v1589_v23  ;;  %v2497_v0 = vrot.slane %v2496_v16, 4 }
 0x27c   : > { %v2478_v8 = vadd.f32 %v2477_v53, %v2476_v33  ;;  %v2487_v10 = vadd.f32 %v2486_v59, %v2485_v36  ;;  %v2498_v24 = vadd.f32 %v2497_v0, %v2496_v16  ;;  %v2548_v59 = vadd.f32 %v2547_v40, %v2546_v14 }
 0x27d   : > { %v1656_v31 = vpop.f32.mrf.mxu0  ;;  %v1692_v1 = vpop.f32.mrf.mxu1  ;;  %v2493_v16 = vmul.f32 %v3836_v58, %v3846_v42  ;;  %v2491_v0 = vmul.f32 %v3821_v2, %v3848_v5 }
 0x27e   : > { %v2560_v32 = vmul.f32 %v2526_v45, %v2478_v8  ;;  %v3854_v41 = vmul.f32 %v2535_v47, %v2487_v10  ;;  %v1724_v46 = vpop.f32.mrf.mxu2  ;;  %v1657_v20 = vadd.f32 %v1656_v31, %v1615_v3  ;;  %v2499_v36 = vrot.slane %v2498_v24, 2 }
 0x27f   : > { %v1776_v49 = vpop.f32.mrf.mxu3  ;;  %v2549_v48 = vrot.slane %v2548_v59, 1  ;;  %v2504_v42 = vsel %vm1458_vm15, %v2493_v16, 0.0 }
 0x280   : > { %2967 = vrsqrt.f32 %v2560_v32  ;;  %v1777_v60 = vadd.f32 %v1776_v49, %v1724_v46  ;;  %v1689_v51 = vadd.f32 %v1688_v28, %v1657_v20  ;;  %vm2569_vm5 = vcmp.eq.f32.partialorder %v2560_v32, inf }
 0x281   : > { %2969 = vrsqrt.f32 %v3854_v41  ;;  %v2572_v15 = vand.u32 2147483648, %v2560_v32  ;;  %v2500_v30 = vadd.f32 %v2499_v36, %v2498_v24  ;;  %vm2571_vm6 = vcmp.eq.f32.partialorder %v2560_v32, 0.0 }
 0x282   : > { %v2416_v19 = vmul.f32 %v3827_v35, %v1689_v51  ;;  %v2489_v51 = vmul.f32 %v3829_v37, %v3812_v29  ;;  %vm2581_vm7 = vcmp.eq.f32.partialorder %v3854_v41, inf  ;;  %vm2583_vm8 = vcmp.eq.f32.partialorder %v3854_v41, 0.0 }
 0x285   : > { %v1660_v22 = vpop.f32.mrf.mxu0  ;;  %v1696_v56 = vpop.f32.mrf.mxu1 }
 0x286   : > { %v2968_v39 = vpop.eup %2967  ;;  %v1661_v43 = vadd.f32 %v1660_v22, %v1621_v54  ;;  %v1732_v26 = vpop.f32.mrf.mxu2 }
 0x287   : > { %v2970_v61 = vpop.eup %2969  ;;  %v1780_v3 = vpop.f32.mrf.mxu3  ;;  %v2563_v62 = vmul.f32 %v2968_v39, %v2560_v32 }
 0x288   : > { %v1693_v44 = vadd.f32 %v1692_v1, %v1661_v43  ;;  %v3861_v9 = vadd.f32 %v1780_v3, %v1732_v26  ;;  %v2575_v11 = vmul.f32 %v2970_v61, %v3854_v41 }
 0x289   : > { %v2564_v18 = vmul.f32 %v2968_v39, %v2563_v62  ;;  %v2503_v62 = vadd.f32 %v2491_v0, %v2489_v51 }
 0x28a   : > { %v2418_v57 = vmul.f32 %v3819_v17, %v1693_v44  ;;  %v2576_v7 = vmul.f32 %v2970_v61, %v2575_v11  ;;  %v2550_v44 = vadd.f32 %v2549_v48, %v2548_v59 }
 0x28b   : > { %v2565_v54 = vmul.f32 0.5, %v2564_v18 }
 0x28c   : > { %v2422_v55 = vadd.f32 %v2418_v57, %v2416_v19  ;;  %v2577_v28 = vmul.f32 0.5, %v2576_v7  ;;  %v2505_v57 = vadd.f32 %v2504_v42, %v2503_v62 }
 0x28d   : > { %v1664_v12 = vpop.f32.mrf.mxu0  ;;  %v1848_v21 = vpop.f32.mrf.mxu1  ;;  %v2566_v27 = vsub.f32 1.5, %v2565_v54 }
 0x28e   : > { %v1665_v25 = vadd.f32 %v1664_v12, %v1627_v4  ;;  %v1740_v34 = vpop.f32.mrf.mxu2  ;;  %v2578_v33 = vsub.f32 1.5, %v2577_v28 }
 0x28f   : > { %v1784_v23 = vpop.f32.mrf.mxu3  ;;  %v2567_v13 = vmul.f32 %v2968_v39, %v2566_v27 }
 0x290   : > { %v1697_v45 = vadd.f32 %v1696_v56, %v1665_v25  ;;  %v3867_v47 = vadd.f32 %v1784_v23, %v1740_v34  ;;  %v2579_v53 = vmul.f32 %v2970_v61, %v2578_v33  ;;  %v2584_v61 = vand.u32 2147483648, %v3854_v41 }
 0x291   : > { %v2568_v8 = vmul.f32 %v2567_v13, %v2560_v32  ;;  %v2506_v34 = vrot.slane %v2505_v57, 4 }
 0x292   : > { %v2420_v10 = vmul.f32 %v3831_v38, %v1697_v45  ;;  %v2580_v4 = vmul.f32 %v2579_v53, %v3854_v41 }
 0x293   : > { %v2570_v31 = vsel %vm2569_vm5, %v2560_v32, %v2568_v8  ;;  %v2501_v32 = vrot.slane %v2500_v30, 1  ;;  %v2507_v8 = vadd.f32 %v2506_v34, %v2505_v57 }
 0x294   : > { %v2423_v1 = vsel %vm1458_vm15, %v2420_v10, 0.0  ;;  %v2573_v46 = vsel %vm2571_vm6, %v2572_v15, %v2570_v31  ;;  %v2582_v43 = vsel %vm2581_vm7, %v3854_v41, %v2580_v4 }
 0x295   : > { %v2424_v20 = vadd.f32 %v2423_v1, %v2422_v55  ;;  %v1812_v49 = vpop.f32.mrf.mxu0  ;;  %v1854_v63 = vpop.f32.mrf.mxu1  ;;  %v2586_v50 = vmax.f32 %v2573_v46, 1e-08  ;;  %v2585_v3 = vsel %vm2583_vm8, %v2584_v61, %v2582_v43  ;;  %v2502_v11 = vadd.f32 %v2501_v32, %v2500_v30 }
 0x296   : > { %v1813_v6 = vadd.f32 %v1812_v49, %v1777_v60  ;;  %v1890_v22 = vpop.f32.mrf.mxu2  ;;  %v3883_v54 = vmax.f32 %v2585_v3, 1e-08  ;;  %v2508_v32 = vrot.slane %v2507_v8, 2 }
 0x297   : > { %v2425_v56 = vrot.slane %v2424_v20, 4  ;;  %v1922_v39 = vpop.f32.mrf.mxu3  ;;  %2971 = vrcp.f32 %v2586_v50  ;;  %v3886_v40 = vmul.f32 %v2550_v44, %v2502_v11  ;;  %v2597_v33 = vand.u32 2147483647, %v2586_v50 }
 0x298   : > { %v1849_v26 = vadd.f32 %v1848_v21, %v1813_v6  ;;  %v2554_v21 = vrot.slane %v3766_v52, 4  ;;  %v2599_v36 = vand.u32 2147483648, %v2586_v50  ;;  %2973 = vrcp.f32 %v3883_v54 }
 0x299   : > { %v2426_v29 = vadd.f32 %v2425_v56, %v2424_v20  ;;  %2975 = vrsqrt.f32 %v3886_v40  ;;  %vm2593_vm10 = vweird.f32 %v2586_v50  ;;  %vm2598_vm12 = vcmp.eq.f32.partialorder %v2597_v33, 8.507059e+37 }
 0x29a   : > { %v1891_v60 = vadd.f32 %v1890_v22, %v1849_v26  ;;  %v2600_v31 = vor.u32 1.1754944e-38, %v2599_v36  ;;  %v2614_v33 = vand.u32 2147483648, %v3883_v54  ;;  %vm2608_vm14 = vweird.f32 %v3883_v54 }
 0x29b   : > { %v2427_v14 = vrot.slane %v2426_v29, 2  ;;  %vm2627_vm2 = vcmp.eq.f32.partialorder %v3886_v40, inf  ;;  %vm2629_vm3 = vcmp.eq.f32.partialorder %v3886_v40, 0.0 }
 0x29c   : > { %v1923_v18 = vadd.f32 %v1922_v39, %v1891_v60 }
 0x29d   : > { %v2972_v19 = vpop.eup %2971  ;;  %v1817_v7 = vpop.f32.mrf.mxu0  ;;  %v2428_v28 = vadd.f32 %v2427_v14, %v2426_v29  ;;  %v2509_v29 = vadd.f32 %v2508_v32, %v2507_v8 }
 0x29e   : > { %v1860_v24 = vpop.f32.mrf.mxu1  ;;  %v1818_v5 = vadd.f32 %v1817_v7, %v3861_v9  ;;  %v1894_v55 = vpop.f32.mrf.mxu2  ;;  %v2589_v41 = vmul.f32 %v2972_v19, %v2586_v50  ;;  %vm2594_vm9 = vweird.f32 %v2972_v19  ;;  %v2555_v9 = vadd.f32 %v2554_v21, %v3766_v52 }
 0x29f   : > { %v1926_v12 = vpop.f32.mrf.mxu3  ;;  %v2429_v13 = vrot.slane %v2428_v28, 1  ;;  %v2417_v10 = vmul.f32 %v3829_v37, %v1923_v18  ;;  %vm2595_vm11 = vmor %vm2593_vm10, %vm2594_vm9  ;;  %v2974_v52 = vpop.eup %2973 }
 0x2a0   : > { %v1855_v27 = vadd.f32 %v1854_v63, %v1818_v5  ;;  %v2590_v25 = vsub.f32 1.0, %v2589_v41  ;;  %v2976_v6 = vpop.eup %2975  ;;  %v2556_v22 = vrot.slane %v2555_v9, 2  ;;  %v2604_v39 = vmul.f32 %v2974_v52, %v3883_v54 }
 0x2a1   : > { %v2430_v48 = vadd.f32 %v2429_v13, %v2428_v28  ;;  %v2621_v26 = vmul.f32 %v2976_v6, %v3886_v40  ;;  %vm2609_vm13 = vweird.f32 %v2974_v52  ;;  %v2612_v13 = vand.u32 2147483647, %v3883_v54 }
 0x2a2   : > { %v1895_v23 = vadd.f32 %v1894_v55, %v1855_v27  ;;  %v2591_v45 = vmul.f32 %v2972_v19, %v2590_v25  ;;  %v2557_v0 = vadd.f32 %v2556_v22, %v2555_v9  ;;  %v2605_v62 = vsub.f32 1.0, %v2604_v39  ;;  %vm2610_vm0 = vmor %vm2608_vm14, %vm2609_vm13 }
 0x2a3   : > { %v2622_v11 = vmul.f32 %v2976_v6, %v2621_v26  ;;  %vm2613_vm1 = vcmp.eq.f32.partialorder %v2612_v13, 8.507059e+37 }
 0x2a4   : > { %v1927_v53 = vadd.f32 %v1926_v12, %v1895_v23  ;;  %v2592_v59 = vadd.f32 %v2972_v19, %v2591_v45  ;;  %v2558_v18 = vrot.slane %v2557_v0, 1  ;;  %v2606_v7 = vmul.f32 %v2974_v52, %v2605_v62 }
 0x2a5   : > { %v1822_v15 = vpop.f32.mrf.mxu0 }
 0x2a6   : > { %v3893_v30 = vpop.f32.mrf.mxu1  ;;  %v2419_v4 = vmul.f32 %v3821_v2, %v1927_v53  ;;  %v1823_v1 = vadd.f32 %v1822_v15, %v3867_v47  ;;  %v1898_v46 = vpop.f32.mrf.mxu2  ;;  %v2596_v20 = vsel %vm2595_vm11, %v2972_v19, %v2592_v59  ;;  %v2510_v19 = vrot.slane %v2509_v29, 1 }
 0x2a7   : > { %v1930_v49 = vpop.f32.mrf.mxu3  ;;  %v2601_v63 = vsel %vm2598_vm12, %v2600_v31, %v2596_v20  ;;  %v2559_v41 = vadd.f32 %v2558_v18, %v2557_v0  ;;  %v2607_v34 = vadd.f32 %v2974_v52, %v2606_v7  ;;  %v2615_v59 = vor.u32 1.1754944e-38, %v2614_v33 }
 0x2a8   : > { %v2431_v50 = vadd.f32 %v2419_v4, %v2417_v10  ;;  %v1861_v51 = vadd.f32 %v1860_v24, %v1823_v1  ;;  %v3897_v16 = vmul.f32 %v2601_v63, %v2430_v48  ;;  %v2623_v24 = vmul.f32 0.5, %v2622_v11 }
 0x2a9   : > { %v2511_v12 = vadd.f32 %v2510_v19, %v2509_v29  ;;  %v2611_v53 = vsel %vm2610_vm0, %v2974_v52, %v2607_v34 }
 0x2aa   : > { %v1899_v56 = vadd.f32 %v1898_v46, %v1861_v51  ;;  %v2624_v36 = vsub.f32 1.5, %v2623_v24  ;;  %v2616_v1 = vsel %vm2613_vm1, %v2615_v59, %v2611_v53 }
 0x2ab   : > { %v3908_v45 = vmul.f32 %v2559_v41, %v2511_v12 }
 0x2ac   : > { %v1931_v43 = vadd.f32 %v1930_v49, %v1899_v56  ;;  %v2625_v8 = vmul.f32 %v2976_v6, %v2624_v36 }
 0x2ad   : > { %v1973_v47 = vpop.f32.mrf.mxu0  ;;  %2977 = vrsqrt.f32 %v3908_v45  ;;  %vm2639_vm4 = vcmp.eq.f32.partialorder %v3908_v45, inf  ;;  %vm2641_vm5 = vcmp.eq.f32.partialorder %v3908_v45, 0.0 }
 0x2ae   : > { %v2029_v61 = vpop.f32.mrf.mxu1  ;;  %v2421_v42 = vmul.f32 %v3836_v58, %v1931_v43  ;;  %v2061_v60 = vpop.f32.mrf.mxu2  ;;  %v2626_v54 = vmul.f32 %v2625_v8, %v3886_v40  ;;  %v2026_v6 = vadd.f32 %v3893_v30, %v1973_v47 }
 0x2af   : > { %v3902_v3 = vpop.f32.mrf.mxu3 }
 0x2b0   : > { %v2432_v44 = vsel %vm1458_vm15, %v2421_v42, 0.0  ;;  %v2628_v52 = vsel %vm2627_vm2, %v3886_v40, %v2626_v54  ;;  %v2062_v0 = vadd.f32 %v2061_v60, %v2026_v6 }
 0x2b1   : > { %v2433_v14 = vadd.f32 %v2432_v44, %v2431_v50  ;;  %v2630_v50 = vand.u32 2147483648, %v3886_v40 }
 0x2b2   : > { %v2098_v40 = vadd.f32 %v3902_v3, %v2062_v0 }
 0x2b3   : > { %v2434_v57 = vrot.slane %v2433_v14, 4  ;;  %v2978_v20 = vpop.eup %2977  ;;  %v2631_v56 = vsel %vm2629_vm3, %v2630_v50, %v2628_v52 }
 0x2b4   : > { %v2633_v39 = vmul.f32 %v2978_v20, %v3908_v45  ;;  %v3920_v26 = vmax.f32 %v2631_v56, 1e-08 }
 0x2b5   : > { %v2435_v5 = vadd.f32 %v2434_v57, %v2433_v14  ;;  %v1981_v55 = vpop.f32.mrf.mxu0 }
 0x2b6   : > { %v2033_v28 = vpop.f32.mrf.mxu1  ;;  %v2066_v21 = vpop.f32.mrf.mxu2  ;;  %v2030_v49 = vadd.f32 %v2029_v61, %v1981_v55  ;;  %v2634_v29 = vmul.f32 %v2978_v20, %v2633_v39  ;;  %2979 = vrcp.f32 %v3920_v26  ;;  %vm2651_vm7 = vweird.f32 %v3920_v26 }
 0x2b7   : > { %v2436_v27 = vrot.slane %v2435_v5, 2  ;;  %v2103_v25 = vpop.f32.mrf.mxu3  ;;  %v2655_v56 = vand.u32 2147483647, %v3920_v26 }
 0x2b8   : > { %v2067_v43 = vadd.f32 %v2066_v21, %v2030_v49  ;;  %v2635_v47 = vmul.f32 0.5, %v2634_v29  ;;  %v2657_v49 = vand.u32 2147483648, %v3920_v26 }
 0x2b9   : > { %v2437_v23 = vadd.f32 %v2436_v27, %v2435_v5  ;;  %vm2656_vm9 = vcmp.eq.f32.partialorder %v2655_v56, 8.507059e+37  ;;  %v2693_v56 = vld [vmem:[%s3202_s27] sm:$0x1] }
 0x2ba   : > { %v2104_v61 = vadd.f32 %v2103_v25, %v2067_v43  ;;  %v2636_v7 = vsub.f32 1.5, %v2635_v47  ;;  %v2658_v29 = vor.u32 1.1754944e-38, %v2657_v49 }
 0x2bb   : > { %v2438_v9 = vrot.slane %v2437_v23, 1 }
 0x2bc   : > { %v2980_v24 = vpop.eup %2979  ;;  %v2637_v27 = vmul.f32 %v2978_v20, %v2636_v7 }
 0x2bd   : > { %v1989_v10 = vpop.f32.mrf.mxu0  ;;  %v2439_v31 = vadd.f32 %v2438_v9, %v2437_v23  ;;  %v2647_v3 = vmul.f32 %v2980_v24, %v3920_v26  ;;  %vm2652_vm6 = vweird.f32 %v2980_v24 }
 0x2be   : > { %v2171_v15 = vpop.f32.mrf.mxu1  ;;  %v2071_v4 = vpop.f32.mrf.mxu2  ;;  %v2034_v42 = vadd.f32 %v2033_v28, %v1989_v10  ;;  %v2638_v13 = vmul.f32 %v2637_v27, %v3908_v45  ;;  %vm2653_vm8 = vmor %vm2651_vm7, %vm2652_vm6 }
 0x2bf   : > { %v2109_v46 = vpop.f32.mrf.mxu3  ;;  %v3911_v48 = vmul.f32 %v2616_v1, %v2439_v31  ;;  %v2648_v9 = vsub.f32 1.0, %v2647_v3 }
 0x2c0   : > { %v2072_v14 = vadd.f32 %v2071_v4, %v2034_v42  ;;  %v2640_v31 = vsel %vm2639_vm4, %v3908_v45, %v2638_v13 }
 0x2c1   : > { %v2649_v4 = vmul.f32 %v2980_v24, %v2648_v9 }
 0x2c2   : > { %v2110_v5 = vadd.f32 %v2109_v46, %v2072_v14 }
 0x2c3   : > { %v2650_v20 = vadd.f32 %v2980_v24, %v2649_v4 }
 0x2c5   : > { %v2139_v63 = vpop.f32.mrf.mxu0 }
 0x2c6   : > { %v2207_v51 = vpop.f32.mrf.mxu2  ;;  %v2175_v22 = vpop.f32.mrf.mxu1  ;;  %v2140_v18 = vadd.f32 %v2139_v63, %v2098_v40 }
 0x2c7   : > { %v2259_v32 = vpop.f32.mrf.mxu3 }
 0x2c8   : > { %v2172_v60 = vadd.f32 %v2171_v15, %v2140_v18  ;;  %v2260_v46 = vadd.f32 %v2259_v32, %v2207_v51  ;;  %v2654_v51 = vsel %vm2653_vm8, %v2980_v24, %v2650_v20 }
 0x2ca   : > { %v2440_v34 = vmul.f32 %v3827_v35, %v2172_v60  ;;  %v2642_v35 = vand.u32 2147483648, %v3908_v45 }
 0x2cc   : > { %v2643_v1 = vsel %vm2641_vm5, %v2642_v35, %v2640_v31 }
 0x2cd   : > { %v2143_v62 = vpop.f32.mrf.mxu0  ;;  %v2645_v43 = vmax.f32 %v2643_v1, 1e-08 }
 0x2ce   : > { %v2215_v44 = vpop.f32.mrf.mxu2  ;;  %v2144_v11 = vadd.f32 %v2143_v62, %v2104_v61  ;;  %v2179_v19 = vpop.f32.mrf.mxu1 }
 0x2cf   : > { %v2263_v30 = vpop.f32.mrf.mxu3  ;;  %2981 = vrcp.f32 %v2645_v43  ;;  %vm2666_vm11 = vweird.f32 %v2645_v43 }
 0x2d0   : > { %v2176_v57 = vadd.f32 %v2175_v22, %v2144_v11  ;;  %v2264_v52 = vadd.f32 %v2263_v30, %v2215_v44  ;;  %v2659_v44 = vsel %vm2656_vm9, %v2658_v29, %v2654_v51 }
 0x2d2   : > { %v2442_v12 = vmul.f32 %v3819_v17, %v2176_v57 }
 0x2d4   : > { %v2446_v36 = vadd.f32 %v2442_v12, %v2440_v34 }
 0x2d5   : > { %v2147_v55 = vpop.f32.mrf.mxu0  ;;  %v2982_v7 = vpop.eup %2981 }
 0x2d6   : > { %v2148_v28 = vadd.f32 %v2147_v55, %v2110_v5  ;;  %v2223_v41 = vpop.f32.mrf.mxu2  ;;  %v2331_v23 = vpop.f32.mrf.mxu1  ;;  %v2662_v27 = vmul.f32 %v2982_v7, %v2645_v43  ;;  %vm2667_vm10 = vweird.f32 %v2982_v7 }
 0x2d7   : > { %v2267_v21 = vpop.f32.mrf.mxu3  ;;  %vm2668_vm12 = vmor %vm2666_vm11, %vm2667_vm10 }
 0x2d8   : > { %v2180_v25 = vadd.f32 %v2179_v19, %v2148_v28  ;;  %v2268_v30 = vadd.f32 %v2267_v21, %v2223_v41  ;;  %v2663_v34 = vsub.f32 1.0, %v2662_v27 }
 0x2da   : > { %v2444_v33 = vmul.f32 %v3831_v38, %v2180_v25 }
 0x2dc   : > { %v2447_v53 = vsel %vm1458_vm15, %v2444_v33, 0.0 }
 0x2dd   : > { %v2448_v59 = vadd.f32 %v2447_v53, %v2446_v36  ;;  %v2295_v8 = vpop.f32.mrf.mxu0 }
 0x2de   : > { %v2373_v10 = vpop.f32.mrf.mxu2  ;;  %v2296_v63 = vadd.f32 %v2295_v8, %v2260_v46  ;;  %v2337_v50 = vpop.f32.mrf.mxu1  ;;  %v2670_v8 = vand.u32 2147483647, %v2645_v43 }
 0x2df   : > { %v2449_v17 = vrot.slane %v2448_v59, 4  ;;  %v2405_v15 = vpop.f32.mrf.mxu3 }
 0x2e0   : > { %v2332_v42 = vadd.f32 %v2331_v23, %v2296_v63  ;;  %v2664_v23 = vmul.f32 %v2982_v7, %v2663_v34  ;;  %vm2671_vm13 = vcmp.eq.f32.partialorder %v2670_v8, 8.507059e+37 }
 0x2e1   : > { %v2450_v38 = vadd.f32 %v2449_v17, %v2448_v59  ;;  %v2672_v59 = vand.u32 2147483648, %v2645_v43 }
 0x2e2   : > { %v2374_v47 = vadd.f32 %v2373_v10, %v2332_v42  ;;  %v2665_v53 = vadd.f32 %v2982_v7, %v2664_v23 }
 0x2e3   : > { %v2451_v54 = vrot.slane %v2450_v38, 2  ;;  %v2673_v17 = vor.u32 1.1754944e-38, %v2672_v59 }
 0x2e4   : > { %v2406_v5 = vadd.f32 %v2405_v15, %v2374_v47 }
 0x2e5   : > { %v2300_v6 = vpop.f32.mrf.mxu0  ;;  %v2452_v22 = vadd.f32 %v2451_v54, %v2450_v38 }
 0x2e6   : > { %v2301_v39 = vadd.f32 %v2300_v6, %v2264_v52  ;;  %v2377_v45 = vpop.f32.mrf.mxu2  ;;  %v2343_v19 = vpop.f32.mrf.mxu1  ;;  %v2441_v25 = vmul.f32 %v3829_v37, %v2406_v5  ;;  %v2669_v37 = vsel %vm2668_vm12, %v2982_v7, %v2665_v53 }
 0x2e7   : > { %v2453_v0 = vrot.slane %v2452_v22, 1  ;;  %v2409_v61 = vpop.f32.mrf.mxu3  ;;  %v2674_v15 = vsel %vm2671_vm13, %v2673_v17, %v2669_v37 }
 0x2e8   : > { %v2338_v32 = vadd.f32 %v2337_v50, %v2301_v39 }
 0x2e9   : > { %v2454_v62 = vadd.f32 %v2453_v0, %v2452_v22 }
 0x2ea   : > { %v2378_v40 = vadd.f32 %v2377_v45, %v2338_v32 }
 0x2eb   : > { %v2660_v11 = vmul.f32 %v2659_v44, %v2454_v62 }
 0x2ec   : > { %v2410_v57 = vadd.f32 %v2409_v61, %v2378_v40 }
 0x2ed   : > { %v2305_v14 = vpop.f32.mrf.mxu0  ;;  %v2676_v26 = vsub.f32 %v3897_v16, %v2660_v11 }
 0x2ee   : > { %v2306_v18 = vadd.f32 %v2305_v14, %v2268_v30  ;;  %v2381_v60 = vpop.f32.mrf.mxu2  ;;  %v2443_v28 = vmul.f32 %v3821_v2, %v2410_v57 }
 0x2ef   : > { %v2413_v12 = vpop.f32.mrf.mxu3  ;;  %v2678_v35 = vmul.f32 %v2676_v26, %v2676_v26 }
 0x2f0   : > { %v2344_v24 = vadd.f32 %v2343_v19, %v2306_v18  ;;  %v2455_v21 = vadd.f32 %v2443_v28, %v2441_v25 }
 0x2f2   : > { %v2382_v55 = vadd.f32 %v2381_v60, %v2344_v24 }
 0x2f4   : > { %v2414_v3 = vadd.f32 %v2413_v12, %v2382_v55 }
 0x2f6   : > { %v2445_v41 = vmul.f32 %v3836_v58, %v2414_v3 }
 0x2f8   : > { %v2456_v16 = vsel %vm1458_vm15, %v2445_v41, 0.0  ;;  %vm2680_vm15 = vcmask 1040384  }
 0x2f9   : > { %v2457_v33 = vadd.f32 %v2456_v16, %v2455_v21  ;;  %v2681_v1 = vsel %vm2680_vm15, %v2678_v35, 0.0 }
 0x2fb   : > { %v2458_v36 = vrot.slane %v2457_v33, 4 }
 0x2fd   : > { %v2459_v13 = vadd.f32 %v2458_v36, %v2457_v33 }
 0x2ff   : > { %v2460_v9 = vrot.slane %v2459_v13, 2 }
 0x301   : > { %v2461_v2 = vadd.f32 %v2460_v9, %v2459_v13 }
 0x303   : > { %v2462_v10 = vrot.slane %v2461_v2, 1 }
 0x305   : > { %v2463_v58 = vadd.f32 %v2462_v10, %v2461_v2 }
 0x307   : > { %v2675_v31 = vmul.f32 %v2674_v15, %v2463_v58 }
 0x309   : > { %v2677_v4 = vsub.f32 %v3911_v48, %v2675_v31 }
 0x30b   : > { %v2679_v38 = vmul.f32 %v2677_v4, %v2677_v4 }
 0x30d   : > { %v2682_v46 = vsel %vm2680_vm15, %v2679_v38, 0.0 }
 0x30e   : > { %v2683_v54 = vadd.f32 %v2682_v46, %v2681_v1 }
 0x310   : > { %2684 = vadd.xlane.f32.xlu2 %v2683_v54 }
 0x383   : > { %v2685_v20 = vpop.xlane.xlu2 %2684 }
 0x384   : > { %v2686_v52 = vrot.slane %v2685_v20, 4 }
 0x386   : > { %v2687_v49 = vadd.f32 %v2686_v52, %v2685_v20 }
 0x388   : > { %v2688_v63 = vrot.slane %v2687_v49, 2 }
 0x38a   : > { %v2689_v50 = vadd.f32 %v2688_v63, %v2687_v49 }
 0x38c   : > { %v2690_v6 = vrot.slane %v2689_v50, 1 }
 0x38e   : > { %v2691_v22 = vadd.f32 %v2690_v6, %v2689_v50 }
 0x390   : > { %2881 = vpush %v2691_v22 }
 0x3c1   : > { %s2882_s15 = spop %2881 }
 0x3c2   : > { %v2694_v48 = vstv %s2882_s15 }
 0x3c3   : > { %v2695_v39 = vadd.f32 %v2694_v48, %v2693_v56 }
 0x3c5   : > { %2696 = vst [vmem:[%s3202_s27] sm:$0x1] %v2695_v39 }
 0x3c6 PF: > { %s2706_s5 = scalar_lea.hbm %s3993_s3, %s3065_s16  ;;  %s2708_s6 = sshll.u32 %s3202_s27, 4  ;;  %s2709_s6 = int_to_ptr.vmem [resolvable:$true] %s2708_s6 }
 0x3c7   : > { %s2710_s7 = sshll.u32 %s2706_s5, 4  ;;  %s2698_s8 = scalar_lea.sflag [#allocation6], %s241_s29  ;;  %s2711_s7 = int_to_ptr.hbm [resolvable:$true] %s2710_s7 }
 0x3c8   : > { %s2997_s9 = sshra.s32 %s2711_s7, 4  ;;  %s3003_s21 = scalar_lea.hbm %s3993_s3, 2  ;;  %s2998_s9 = int_to_ptr.hbm [resolvable:$true] %s2997_s9 }
 0x3c9   : > { %s2999_s10 = scalar_lea.hbm %s2998_s9, 1  ;;  %p3004_p6 = scmp.lt.s32.totalorder %s2998_s9, %s3993_s3 }
 0x3ca   : > { %p3000_p2 = scmp.ne.s32.totalorder %s2998_s9, %s2999_s10  ;;  %p3005_p7 = scmp.lt.s32.totalorder %s3003_s21, %s2999_s10 }
 0x3cc   : > { %p3001_p4 = pnand %p3000_p2, %p3153_p3  ;;  %p3006_p8 = por %p3005_p7, %p3004_p6 }
 0x3ce   : > { %p3002_p5 = pneg %p3001_p4 }
 0x3d0   : > { %p3007_p10 = pnand %p3006_p8, %p3002_p5 }
 0x3d2   : > { %3010 = shalt.err (!%p3007_p10)
}
 0x3d3   : > { %2883 = dma.vmem_to_hbm [thread:$0]  (%p3153_p3), %s2709_s6, 16, %s2711_s7, %s2698_s8  }
 0x3d4 PF: > { %p2889_p11 = scmp.ge.s32.totalorder %s3077_s19, 2  ;;  %s2722_s16 = sand.u32 1, %s3049_s12  }
 0x3d5   : > { %s2723_s29 = scalar_lea.sflag [#allocation6], %s2722_s16 }
 0x3d6   : > { %p2886_p12 = pnand %p2889_p11, %p3163_p9 }
 0x3d8   : > { %p2887_p13 = pneg %p2886_p12 }
 0x3da   : > { %3044 = dma.done.wait (%p2887_p13), %s2723_s29, 16  }
 0x3db   : > { %3046 = vsyncadd (%p2887_p13), %s2723_s29, 4294967280  ;;  %s16_s19 = sadd.s32 1, %s3077_s19   ;;  %s4012_s12 = smov %s3053_s13 }
 0x3dc   : > { %p13_p0 = scmp.ge.s32.totalorder %s16_s19, 6   ;;  %s4013_s13 = smov %s3057_s14 }
 0x3dd   : > { %s4014_s14 = smov %s3171_s28  ;;  %s4015_s15 = smov %s3069_s17 }
 0x3de   : > { %s4016_s16 = smov %s3073_s18  ;;  %s4017_s17 = smov %s4020_s22 }
 0x3df   : > { %s4018_s18 = smov %s4024_s23  ;;  %15 = sbr.rel (!%p13_p0) target bundleno = 5 (0x5), region = 85 }
 0x3e4   :  { %2728 = vsyncpa [#allocation6], 1 }
 0x3e5   :  { %2730 = vsyncpa [#allocation6 + $0x1], 1 }

</bundles_post_ra>
